<compile_context>
chip_gen: v7x
topology: tpu7x:2x2x1
jax: 0.10.0
libtpu: 0.0.40
codegen_flags: <defaults>
</compile_context>

<pallas_src>
import functools
import math

import jax
import jax.numpy as jnp
from jax import lax
from jax.experimental import pallas as pl
from jax.experimental.pallas import tpu as pltpu


# -----------------------------------------------------------------------------
# Kernel
# -----------------------------------------------------------------------------
def _dit_block_kernel(
    # inputs
    x_ref,        # (1, N, H)      f32  full token sequence for this batch row
    c_ref,        # (1, 1, H)      f32  conditioning vector
    w_ada_ref,    # (H, 6H)        bf16
    b_ada_ref,    # (1, 6H)        f32
    w_q_ref,      # (H, nh*hdp)    bf16  head-padded
    w_k_ref,      # (H, nh*hdp)    bf16
    w_v_ref,      # (H, nh*hdp)    bf16
    b_q_ref,      # (1, nh*hdp)    f32
    b_k_ref,      # (1, nh*hdp)    f32
    b_v_ref,      # (1, nh*hdp)    f32
    w_proj_ref,   # (nh*hdp, H)    bf16  zero rows on head padding
    b_proj_ref,   # (1, H)         f32
    w_mlp1_ref,   # (H, Hm)        bf16
    b_mlp1_ref,   # (1, Hm)        f32
    w_mlp2_ref,   # (Hm, H)        bf16
    b_mlp2_ref,   # (1, H)         f32
    # outputs
    out_ref,      # (1, tq, H)     f32
    # scratch
    xa_scr,       # (N, H)         bf16  modulate(norm1(x)) for the full sequence
    attn_scr,     # (tq, nh*hdp)   bf16  per-head attention outputs
    *,
    seq_len, q_tile, kv_tile, num_heads, head_dim, head_dim_pad,
    hidden, mlp_hidden, mlp_tile, eps,
):
  f32, bf16 = jnp.float32, jnp.bfloat16
  N, tq, kt = seq_len, q_tile, kv_tile
  H, Hm = hidden, mlp_hidden
  nh, hd, hdp = num_heads, head_dim, head_dim_pad
  nkv = N // kt
  nhm = Hm // mlp_tile
  sm_scale = 1.0 / math.sqrt(hd)            # scale uses the TRUE head dim

  toff = pl.multiple_of(pl.program_id(1) * tq, tq)

  def layernorm(v):                         # elementwise_affine=False, f32 stats
    mu = jnp.mean(v, axis=-1, keepdims=True)
    var = jnp.mean(jnp.square(v - mu), axis=-1, keepdims=True)
    return (v - mu) * jax.lax.rsqrt(var + eps)

  # ---- adaLN modulation: SiLU(c) -> Linear(H, 6H) (tiny, per grid step) -----
  c_vec = c_ref[0].astype(f32)                                     # (1, H)
  c_act = c_vec * jax.nn.sigmoid(c_vec)                            # SiLU, f32
  mod = jnp.dot(c_act.astype(bf16), w_ada_ref[...],
                preferred_element_type=f32) + b_ada_ref[...]       # (1, 6H) f32
  shift_msa = mod[:, 0 * H:1 * H]
  scale_msa = mod[:, 1 * H:2 * H]
  gate_msa = mod[:, 2 * H:3 * H]
  shift_mlp = mod[:, 3 * H:4 * H]
  scale_mlp = mod[:, 4 * H:5 * H]
  gate_mlp = mod[:, 5 * H:6 * H]

  # ---- norm1 + modulate over the FULL sequence (K/V need every token) ------
  x_full = x_ref[0].astype(f32)                                    # (N, H)
  xa_scr[...] = (layernorm(x_full) * (1.0 + scale_msa) + shift_msa).astype(bf16)
  xa_q = xa_scr[pl.ds(toff, tq), :]                                # (tq, H) bf16

  # ---- multi-head attention: head loop + flash (online-softmax) KV tiling --
  @pl.loop(0, nh)
  def _per_head(h):
    hoff = pl.multiple_of(h * hdp, hdp)                            # 128-aligned
    q_h = (jnp.dot(xa_q, w_q_ref[:, pl.ds(hoff, hdp)],
                   preferred_element_type=f32)
           + b_q_ref[:, pl.ds(hoff, hdp)]).astype(bf16)            # (tq, hdp)

    def kv_step(j, carry):
      m_i, l_i, acc = carry
      koff = pl.multiple_of(j * kt, kt)
      xa_kv = xa_scr[pl.ds(koff, kt), :]                           # (kt, H) bf16
      k_t = (jnp.dot(xa_kv, w_k_ref[:, pl.ds(hoff, hdp)],
                     preferred_element_type=f32)
             + b_k_ref[:, pl.ds(hoff, hdp)]).astype(bf16)          # (kt, hdp)
      v_t = (jnp.dot(xa_kv, w_v_ref[:, pl.ds(hoff, hdp)],
                     preferred_element_type=f32)
             + b_v_ref[:, pl.ds(hoff, hdp)]).astype(bf16)          # (kt, hdp)
      s = jnp.einsum("qd,kd->qk", q_h, k_t,
                     preferred_element_type=f32) * sm_scale        # (tq, kt) f32
      m_new = jnp.maximum(m_i, jnp.max(s, axis=-1, keepdims=True))
      alpha = jnp.exp(m_i - m_new)
      p = jnp.exp(s - m_new)
      l_new = alpha * l_i + jnp.sum(p, axis=-1, keepdims=True)
      acc_new = alpha * acc + jnp.dot(p.astype(bf16), v_t,
                                      preferred_element_type=f32)
      return m_new, l_new, acc_new

    m0 = jnp.full((tq, 1), -1e30, dtype=f32)
    l0 = jnp.zeros((tq, 1), dtype=f32)
    a0 = jnp.zeros((tq, hdp), dtype=f32)
    m_i, l_i, acc = lax.fori_loop(0, nkv, kv_step, (m0, l0, a0))
    attn_scr[:, pl.ds(hoff, hdp)] = (acc / l_i).astype(bf16)       # exact norm

  attn_out = jnp.dot(attn_scr[...], w_proj_ref[...],
                     preferred_element_type=f32) + b_proj_ref[...]  # (tq, H)
  x_res = x_ref[0, pl.ds(toff, tq), :].astype(f32) + gate_msa * attn_out

  # ---- MLP branch, tiled over the Hm hidden dimension ----------------------
  xm = (layernorm(x_res) * (1.0 + scale_mlp) + shift_mlp).astype(bf16)

  def mlp_step(ci, acc):
    coff = pl.multiple_of(ci * mlp_tile, mlp_tile)
    h1 = (jnp.dot(xm, w_mlp1_ref[:, pl.ds(coff, mlp_tile)],
                  preferred_element_type=f32)
          + b_mlp1_ref[:, pl.ds(coff, mlp_tile)])                  # (tq, mt) f32
    h1 = jax.nn.gelu(h1, approximate=True)                         # tanh GELU
    return acc + jnp.dot(h1.astype(bf16),
                         w_mlp2_ref[pl.ds(coff, mlp_tile), :],
                         preferred_element_type=f32)

  mlp_out = lax.fori_loop(0, nhm, mlp_step,
                          jnp.zeros((tq, H), dtype=f32)) + b_mlp2_ref[...]
  out_ref[0] = (x_res + gate_mlp * mlp_out).astype(out_ref.dtype)


# -----------------------------------------------------------------------------
# One-time host-side weight preparation (call OUTSIDE the step and cache).
# -----------------------------------------------------------------------------
def prepare_dit_params(params, *, num_heads):
  H = params["w_ada"].shape[0]
  Hm = params["w_mlp1"].shape[1]
  assert H % num_heads == 0
  hd = H // num_heads
  hdp = ((hd + 127) // 128) * 128          # pad each head's slice to 128 lanes
  nhdp = num_heads * hdp
  bf16, f32 = jnp.bfloat16, jnp.float32

  w_qkv = params["w_qkv"].astype(f32)
  b_qkv = params["b_qkv"].astype(f32)

  def pad_head_cols(w, b):                 # w: (H, nh*hd), b: (nh*hd,)
    w3 = jnp.pad(w.reshape(H, num_heads, hd), ((0, 0), (0, 0), (0, hdp - hd)))
    b2 = jnp.pad(b.reshape(num_heads, hd), ((0, 0), (0, hdp - hd)))
    return w3.reshape(H, nhdp).astype(bf16), b2.reshape(1, nhdp).astype(f32)

  w_q, b_q = pad_head_cols(w_qkv[:, 0 * H:1 * H], b_qkv[0 * H:1 * H])
  w_k, b_k = pad_head_cols(w_qkv[:, 1 * H:2 * H], b_qkv[1 * H:2 * H])
  w_v, b_v = pad_head_cols(w_qkv[:, 2 * H:3 * H], b_qkv[2 * H:3 * H])

  w_proj = params["w_proj"].astype(f32).reshape(num_heads, hd, H)
  w_proj = jnp.pad(w_proj, ((0, 0), (0, hdp - hd), (0, 0))).reshape(nhdp, H)

  return dict(
      num_heads=num_heads, head_dim=hd, head_dim_pad=hdp,
      w_ada=params["w_ada"].astype(bf16),
      b_ada=params["b_ada"].reshape(1, -1).astype(f32),
      w_q=w_q, w_k=w_k, w_v=w_v, b_q=b_q, b_k=b_k, b_v=b_v,
      w_proj=w_proj.astype(bf16),
      b_proj=params["b_proj"].reshape(1, -1).astype(f32),
      w_mlp1=params["w_mlp1"].astype(bf16),
      b_mlp1=params["b_mlp1"].reshape(1, -1).astype(f32),
      w_mlp2=params["w_mlp2"].astype(bf16),
      b_mlp2=params["b_mlp2"].reshape(1, -1).astype(f32),
  )


# -----------------------------------------------------------------------------
# Wrapper
# -----------------------------------------------------------------------------
def dit_block(x, c, prep, *, eps=1e-6, q_tile=512, kv_tile=512, mlp_tile=512,
              weight_buffer_count=1):
  """Fused Pallas implementation of RefDiTBlock.forward.

  x: (B, N, H) tokens, c: (B, H) conditioning, prep: prepare_dit_params output.
  """
  B, N, H = x.shape
  nh, hd, hdp = prep["num_heads"], prep["head_dim"], prep["head_dim_pad"]
  nhdp = nh * hdp
  Hm = prep["w_mlp1"].shape[1]

  tq = min(q_tile, N)
  kt = min(kv_tile, N)
  hm_t = min(mlp_tile, Hm)
  assert N % tq == 0 and N % kt == 0 and Hm % hm_t == 0, (
      "seq / mlp-hidden dims must divide the tile sizes")

  # TODO(synk): accept/produce bf16 x/out on v5e to halve activation HBM traffic.
  x = x.astype(jnp.float32)
  c3 = c.astype(jnp.float32).reshape(B, 1, H)

  kernel = functools.partial(
      _dit_block_kernel,
      seq_len=N, q_tile=tq, kv_tile=kt, num_heads=nh, head_dim=hd,
      head_dim_pad=hdp, hidden=H, mlp_hidden=Hm, mlp_tile=hm_t, eps=eps)

  pipeline_mode = (pl.Buffered(weight_buffer_count)
                   if weight_buffer_count is not None else None)

  def wspec(shape):
    # Constant index_map => tile is VMEM resident across the whole grid;
    # single-buffered so it is not allocated twice.
    idx = lambda b, t: (0,) * len(shape)
    if pipeline_mode is None:
      return pl.BlockSpec(shape, idx)
    return pl.BlockSpec(shape, idx, pipeline_mode=pipeline_mode)

  in_specs = [
      pl.BlockSpec((1, N, H), lambda b, t: (b, 0, 0)),   # x: full sequence row
      pl.BlockSpec((1, 1, H), lambda b, t: (b, 0, 0)),   # c
      wspec((H, 6 * H)), wspec((1, 6 * H)),
      wspec((H, nhdp)), wspec((H, nhdp)), wspec((H, nhdp)),
      wspec((1, nhdp)), wspec((1, nhdp)), wspec((1, nhdp)),
      wspec((nhdp, H)), wspec((1, H)),
      wspec((H, Hm)), wspec((1, Hm)),
      wspec((Hm, H)), wspec((1, H)),
  ]
  out_specs = pl.BlockSpec((1, tq, H), lambda b, t: (b, t, 0))
  grid = (B, N // tq)

  operands = (x, c3,
              prep["w_ada"], prep["b_ada"],
              prep["w_q"], prep["w_k"], prep["w_v"],
              prep["b_q"], prep["b_k"], prep["b_v"],
              prep["w_proj"], prep["b_proj"],
              prep["w_mlp1"], prep["b_mlp1"],
              prep["w_mlp2"], prep["b_mlp2"])

  # ---- VMEM budget: weights (single-buffered) + io blocks + scratch + temps.
  def nbytes(a):
    return int(a.size) * a.dtype.itemsize
  weight_bytes = sum(nbytes(a) for a in operands[2:])
  io_block_bytes = 2 * (N * H * 4) + 2 * (tq * H * 4) + 2 * (H * 4)
  scratch_bytes = N * H * 2 + tq * nhdp * 2
  live_temp_bytes = 4 * (4 * N * H + tq * (kt + 8 * H + 4 * hdp + 3 * hm_t))
  vmem_est = weight_bytes + io_block_bytes + scratch_bytes + live_temp_bytes
  try:
    phys_vmem = int(pltpu.get_tpu_info().vmem_capacity_bytes)
  except Exception:  # noqa: BLE001 - conservative default if query unsupported
    phys_vmem = 128 * 1024 * 1024
  vmem_limit = int(min(int(0.9 * phys_vmem),
                       max(32 * 1024 * 1024, int(1.4 * vmem_est))))

  # Advisory cost estimate so XLA can overlap this custom call.
  nqt = N // tq
  flops = 2 * B * (
      nqt * H * 6 * H                      # adaLN linear (per q tile)
      + nqt * N * H * 2 * nhdp             # K/V projections (per q tile)
      + N * H * nhdp                       # Q projection
      + 2 * N * N * nhdp                   # q@k^T and p@v over all heads
      + N * nhdp * H                       # output projection
      + 2 * N * H * Hm)                    # MLP fc1 + fc2
  transcendentals = B * (nh * N * N + N * Hm + nqt * H + 2 * N)
  bytes_accessed = (nbytes(x) * (1 + nqt) + nbytes(c3) + B * N * H * 4
                    + weight_bytes)

  return pl.pallas_call(
      kernel,
      out_shape=jax.ShapeDtypeStruct((B, N, H), jnp.float32),
      grid=grid,
      in_specs=in_specs,
      out_specs=out_specs,
      scratch_shapes=[
          pltpu.VMEM((N, H), jnp.bfloat16),      # modulate(norm1(x)) full seq
          pltpu.VMEM((tq, nhdp), jnp.bfloat16),  # per-head attention outputs
      ],
      compiler_params=pltpu.CompilerParams(
          dimension_semantics=("parallel", "parallel"),
          vmem_limit_bytes=vmem_limit),
      cost_estimate=pl.CostEstimate(
          flops=int(flops), transcendentals=int(transcendentals),
          bytes_accessed=int(bytes_accessed)),
  )(*operands)


# -----------------------------------------------------------------------------
# Pure-JAX f32 reference mirroring the PyTorch RefDiTBlock.
# -----------------------------------------------------------------------------
def _reference(x, c, params, *, num_heads, eps=1e-6):
  B, N, H = x.shape
  hd = H // num_heads

  def layernorm(v):
    mu = v.mean(-1, keepdims=True)
    var = ((v - mu) ** 2).mean(-1, keepdims=True)
    return (v - mu) / jnp.sqrt(var + eps)

  mod = jax.nn.silu(c) @ params["w_ada"] + params["b_ada"]          # (B, 6H)
  mod = mod[:, None, :]
  (shift_msa, scale_msa, gate_msa,
   shift_mlp, scale_mlp, gate_mlp) = jnp.split(mod, 6, axis=-1)

  xa = layernorm(x) * (1 + scale_msa) + shift_msa
  qkv = xa @ params["w_qkv"] + params["b_qkv"]
  qkv = qkv.reshape(B, N, 3, num_heads, hd).transpose(2, 0, 3, 1, 4)
  q, k, v = qkv[0], qkv[1], qkv[2]
  attn = jnp.einsum("bhqd,bhkd->bhqk", q, k) * (hd ** -0.5)
  attn = jax.nn.softmax(attn, axis=-1)
  out = jnp.einsum("bhqk,bhkd->bhqd", attn, v)
  out = out.transpose(0, 2, 1, 3).reshape(B, N, H)
  out = out @ params["w_proj"] + params["b_proj"]
  x = x + gate_msa * out

  xm = layernorm(x) * (1 + scale_mlp) + shift_mlp
  h1 = jax.nn.gelu(xm @ params["w_mlp1"] + params["b_mlp1"], approximate=True)
  x = x + gate_mlp * (h1 @ params["w_mlp2"] + params["b_mlp2"])
  return x


if __name__ == "__main__":
  B, N, H = 2, 8, 32          # batch, sequence, hidden
  num_heads = 4
  mlp_ratio = 4.0
  Hm = int(H * mlp_ratio)

  key = jax.random.PRNGKey(0)
  keys = jax.random.split(key, 12)
  s = 0.1
  params = {
      "w_ada": jax.random.normal(keys[0], (H, 6 * H), jnp.float32) * s,
      "b_ada": jax.random.normal(keys[1], (6 * H,), jnp.float32) * s,
      "w_qkv": jax.random.normal(keys[2], (H, 3 * H), jnp.float32) * s,
      "b_qkv": jax.random.normal(keys[3], (3 * H,), jnp.float32) * s,
      "w_proj": jax.random.normal(keys[4], (H, H), jnp.float32) * s,
      "b_proj": jax.random.normal(keys[5], (H,), jnp.float32) * s,
      "w_mlp1": jax.random.normal(keys[6], (H, Hm), jnp.float32) * s,
      "b_mlp1": jax.random.normal(keys[7], (Hm,), jnp.float32) * s,
      "w_mlp2": jax.random.normal(keys[8], (Hm, H), jnp.float32) * s,
      "b_mlp2": jax.random.normal(keys[9], (H,), jnp.float32) * s,
  }
  x = jax.random.normal(keys[10], (B, N, H), jnp.float32)
  c = jax.random.normal(keys[11], (B, H), jnp.float32)

  # One-time weight packing (outside the step; no per-forward repack cost).
  prep = prepare_dit_params(params, num_heads=num_heads)

  try:
    out = jax.block_until_ready(dit_block(x, c, prep, weight_buffer_count=1))
  except Exception:
    # Fallback for JAX versions without single-buffer pipeline_mode support:
    # use the default (double-buffered) weight pipeline.
    out = jax.block_until_ready(dit_block(x, c, prep, weight_buffer_count=None))

  ref = _reference(x, c, params, num_heads=num_heads)
  assert out.shape == (B, N, H)
  # bf16 MXU operands (f32 accumulation) -> tolerance set accordingly.
  assert jnp.allclose(out, ref, atol=2e-2, rtol=2e-2), "mismatch vs reference"

  print("KERNEL_OK")
</pallas_src>

<mosaic_0001>
module attributes {stable_mosaic.version = 11 : i64} {
  func.func @_dit_block_kernel(%arg0: i32, %arg1: i32, %arg2: memref<1x8x32xf32, #tpu.memory_space<vmem>>, %arg3: memref<1x1x32xf32, #tpu.memory_space<vmem>>, %arg4: memref<32x192xbf16, #tpu.memory_space<vmem>>, %arg5: memref<1x192xf32, #tpu.memory_space<vmem>>, %arg6: memref<32x512xbf16, #tpu.memory_space<vmem>>, %arg7: memref<32x512xbf16, #tpu.memory_space<vmem>>, %arg8: memref<32x512xbf16, #tpu.memory_space<vmem>>, %arg9: memref<1x512xf32, #tpu.memory_space<vmem>>, %arg10: memref<1x512xf32, #tpu.memory_space<vmem>>, %arg11: memref<1x512xf32, #tpu.memory_space<vmem>>, %arg12: memref<512x32xbf16, #tpu.memory_space<vmem>>, %arg13: memref<1x32xf32, #tpu.memory_space<vmem>>, %arg14: memref<32x128xbf16, #tpu.memory_space<vmem>>, %arg15: memref<1x128xf32, #tpu.memory_space<vmem>>, %arg16: memref<128x32xbf16, #tpu.memory_space<vmem>>, %arg17: memref<1x32xf32, #tpu.memory_space<vmem>>, %arg18: memref<1x8x32xf32, #tpu.memory_space<vmem>>, %arg19: memref<8x32xbf16, #tpu.memory_space<vmem>>, %arg20: memref<8x512xbf16, #tpu.memory_space<vmem>>) attributes {dimension_semantics = [#tpu.dimension_semantics<parallel>, #tpu.dimension_semantics<parallel>], iteration_bounds = array<i64: 2, 1>, scalar_prefetch = 0 : i64, scratch_operands = 2 : i64, tpu.core_type = #tpu.core_type<tc>, window_params = [{transform_indices = @transform_0, window_bounds = array<i64: 1, 8, 32>}, {transform_indices = @transform_1, window_bounds = array<i64: 1, 1, 32>}, {pipeline_mode = #tpu.pipeline_mode<synchronous>, transform_indices = @transform_2, window_bounds = array<i64: 32, 192>}, {pipeline_mode = #tpu.pipeline_mode<synchronous>, transform_indices = @transform_3, window_bounds = array<i64: 1, 192>}, {pipeline_mode = #tpu.pipeline_mode<synchronous>, transform_indices = @transform_4, window_bounds = array<i64: 32, 512>}, {pipeline_mode = #tpu.pipeline_mode<synchronous>, transform_indices = @transform_5, window_bounds = array<i64: 32, 512>}, {pipeline_mode = #tpu.pipeline_mode<synchronous>, transform_indices = @transform_6, window_bounds = array<i64: 32, 512>}, {pipeline_mode = #tpu.pipeline_mode<synchronous>, transform_indices = @transform_7, window_bounds = array<i64: 1, 512>}, {pipeline_mode = #tpu.pipeline_mode<synchronous>, transform_indices = @transform_8, window_bounds = array<i64: 1, 512>}, {pipeline_mode = #tpu.pipeline_mode<synchronous>, transform_indices = @transform_9, window_bounds = array<i64: 1, 512>}, {pipeline_mode = #tpu.pipeline_mode<synchronous>, transform_indices = @transform_10, window_bounds = array<i64: 512, 32>}, {pipeline_mode = #tpu.pipeline_mode<synchronous>, transform_indices = @transform_11, window_bounds = array<i64: 1, 32>}, {pipeline_mode = #tpu.pipeline_mode<synchronous>, transform_indices = @transform_12, window_bounds = array<i64: 32, 128>}, {pipeline_mode = #tpu.pipeline_mode<synchronous>, transform_indices = @transform_13, window_bounds = array<i64: 1, 128>}, {pipeline_mode = #tpu.pipeline_mode<synchronous>, transform_indices = @transform_14, window_bounds = array<i64: 128, 32>}, {pipeline_mode = #tpu.pipeline_mode<synchronous>, transform_indices = @transform_15, window_bounds = array<i64: 1, 32>}, {transform_indices = @transform_16, window_bounds = array<i64: 1, 8, 32>}]} {
    %c8_i32 = arith.constant 8 : i32
    %0 = arith.muli %arg1, %c8_i32 : i32
    %1 = tpu.assume_multiple %0, 8 : i32
    %c0 = arith.constant 0 : index
    %c0_0 = arith.constant 0 : index
    %c0_1 = arith.constant 0 : index
    %2 = vector.load %arg3[%c0, %c0_0, %c0_1] : memref<1x1x32xf32, #tpu.memory_space<vmem>>, vector<1x1x32xf32>
    %3 = vector.shape_cast %2 : vector<1x1x32xf32> to vector<1x32xf32>
    %4 = arith.negf %3 : vector<1x32xf32>
    %5 = math.exp %4 : vector<1x32xf32>
    %cst = arith.constant 1.000000e+00 : f32
    %6 = vector.broadcast %cst : f32 to vector<1x32xf32>
    %7 = arith.addf %6, %5 : vector<1x32xf32>
    %8 = arith.divf %6, %7 : vector<1x32xf32>
    %9 = arith.mulf %3, %8 : vector<1x32xf32>
    %10 = arith.truncf %9 : vector<1x32xf32> to vector<1x32xbf16>
    %c0_2 = arith.constant 0 : index
    %c0_3 = arith.constant 0 : index
    %11 = vector.load %arg4[%c0_2, %c0_3] : memref<32x192xbf16, #tpu.memory_space<vmem>>, vector<32x192xbf16>
    %cst_4 = arith.constant dense<0.000000e+00> : vector<1x192xf32>
    %12 = tpu.matmul %10, %11, %cst_4 {dimension_numbers = #tpu.dot_dimension_numbers<[1], [0], [0], [1], [0, 0, 1, 1], [], []>} : vector<1x32xbf16>, vector<32x192xbf16>, vector<1x192xf32> -> vector<1x192xf32>
    %c0_5 = arith.constant 0 : index
    %c0_6 = arith.constant 0 : index
    %13 = vector.load %arg5[%c0_5, %c0_6] : memref<1x192xf32, #tpu.memory_space<vmem>>, vector<1x192xf32>
    %14 = arith.addf %12, %13 : vector<1x192xf32>
    %15 = vector.extract_strided_slice %14 {offsets = [0, 0], sizes = [1, 32], strides = [1, 1]} : vector<1x192xf32> to vector<1x32xf32>
    %16 = vector.extract_strided_slice %14 {offsets = [0, 32], sizes = [1, 32], strides = [1, 1]} : vector<1x192xf32> to vector<1x32xf32>
    %17 = vector.extract_strided_slice %14 {offsets = [0, 64], sizes = [1, 32], strides = [1, 1]} : vector<1x192xf32> to vector<1x32xf32>
    %18 = vector.extract_strided_slice %14 {offsets = [0, 96], sizes = [1, 32], strides = [1, 1]} : vector<1x192xf32> to vector<1x32xf32>
    %19 = vector.extract_strided_slice %14 {offsets = [0, 128], sizes = [1, 32], strides = [1, 1]} : vector<1x192xf32> to vector<1x32xf32>
    %20 = vector.extract_strided_slice %14 {offsets = [0, 160], sizes = [1, 32], strides = [1, 1]} : vector<1x192xf32> to vector<1x32xf32>
    %c0_7 = arith.constant 0 : index
    %c0_8 = arith.constant 0 : index
    %c0_9 = arith.constant 0 : index
    %21 = vector.load %arg2[%c0_7, %c0_8, %c0_9] : memref<1x8x32xf32, #tpu.memory_space<vmem>>, vector<1x8x32xf32>
    %22 = vector.shape_cast %21 : vector<1x8x32xf32> to vector<8x32xf32>
    %cst_10 = arith.constant dense<0.000000e+00> : vector<8xf32>
    %23 = vector.multi_reduction <add>, %22, %cst_10 [1] : vector<8x32xf32> to vector<8xf32>
    %24 = vector.shape_cast %23 : vector<8xf32> to vector<8x1xf32>
    %cst_11 = arith.constant 3.200000e+01 : f32
    %25 = vector.broadcast %cst_11 : f32 to vector<8x1xf32>
    %26 = arith.divf %24, %25 : vector<8x1xf32>
    %27 = vector.broadcast %26 : vector<8x1xf32> to vector<8x32xf32>
    %28 = arith.subf %22, %27 : vector<8x32xf32>
    %29 = arith.mulf %28, %28 : vector<8x32xf32>
    %cst_12 = arith.constant dense<0.000000e+00> : vector<8xf32>
    %30 = vector.multi_reduction <add>, %29, %cst_12 [1] : vector<8x32xf32> to vector<8xf32>
    %31 = vector.shape_cast %30 : vector<8xf32> to vector<8x1xf32>
    %cst_13 = arith.constant 3.200000e+01 : f32
    %32 = vector.broadcast %cst_13 : f32 to vector<8x1xf32>
    %33 = arith.divf %31, %32 : vector<8x1xf32>
    %34 = vector.broadcast %26 : vector<8x1xf32> to vector<8x32xf32>
    %35 = arith.subf %22, %34 : vector<8x32xf32>
    %cst_14 = arith.constant 9.99999997E-7 : f32
    %36 = vector.broadcast %cst_14 : f32 to vector<8x1xf32>
    %37 = arith.addf %33, %36 : vector<8x1xf32>
    %38 = math.rsqrt %37 : vector<8x1xf32>
    %39 = vector.broadcast %38 : vector<8x1xf32> to vector<8x32xf32>
    %40 = arith.mulf %35, %39 : vector<8x32xf32>
    %cst_15 = arith.constant 1.000000e+00 : f32
    %41 = vector.broadcast %cst_15 : f32 to vector<1x32xf32>
    %42 = arith.addf %41, %16 : vector<1x32xf32>
    %43 = vector.broadcast %42 : vector<1x32xf32> to vector<8x32xf32>
    %44 = arith.mulf %40, %43 : vector<8x32xf32>
    %45 = vector.broadcast %15 : vector<1x32xf32> to vector<8x32xf32>
    %46 = arith.addf %44, %45 : vector<8x32xf32>
    %47 = arith.truncf %46 : vector<8x32xf32> to vector<8x32xbf16>
    %c0_16 = arith.constant 0 : index
    %c0_17 = arith.constant 0 : index
    %48 = vector.load %arg19[%c0_16, %c0_17] : memref<8x32xbf16, #tpu.memory_space<vmem>>, vector<8x32xbf16>
    tpu.vector_store %arg19[%c0_16, %c0_17], %47 {strides = array<i32>} : memref<8x32xbf16, #tpu.memory_space<vmem>>, vector<8x32xbf16>,
    %49 = arith.index_cast %1 : i32 to index
    %c0_18 = arith.constant 0 : index
    %50 = vector.load %arg19[%49, %c0_18] : memref<8x32xbf16, #tpu.memory_space<vmem>>, vector<8x32xbf16>
    %c0_i32 = arith.constant 0 : i32
    %c4_i32 = arith.constant 4 : i32
    %51 = arith.addi %c0_i32, %c4_i32 : i32
    %c1_i32 = arith.constant 1 : i32
    scf.for %arg21 = %c0_i32 to %51 step %c1_i32  : i32 {
      %c1_i32_52 = arith.constant 1 : i32
      %126 = arith.muli %arg21, %c1_i32_52 : i32
      %c0_i32_53 = arith.constant 0 : i32
      %127 = arith.addi %c0_i32_53, %126 : i32
      %c128_i32_54 = arith.constant 128 : i32
      %128 = arith.muli %127, %c128_i32_54 : i32
      %129 = tpu.assume_multiple %128, 128 : i32
      %c0_55 = arith.constant 0 : index
      %130 = arith.index_cast %129 : i32 to index
      %131 = vector.load %arg6[%c0_55, %130] : memref<32x512xbf16, #tpu.memory_space<vmem>>, vector<32x128xbf16>
      %cst_56 = arith.constant dense<0.000000e+00> : vector<8x128xf32>
      %132 = tpu.matmul %50, %131, %cst_56 {dimension_numbers = #tpu.dot_dimension_numbers<[1], [0], [0], [1], [0, 0, 1, 1], [], []>} : vector<8x32xbf16>, vector<32x128xbf16>, vector<8x128xf32> -> vector<8x128xf32>
      %c0_57 = arith.constant 0 : index
      %133 = arith.index_cast %129 : i32 to index
      %134 = vector.load %arg9[%c0_57, %133] : memref<1x512xf32, #tpu.memory_space<vmem>>, vector<1x128xf32>
      %135 = vector.broadcast %134 : vector<1x128xf32> to vector<8x128xf32>
      %136 = arith.addf %132, %135 : vector<8x128xf32>
      %137 = arith.truncf %136 : vector<8x128xf32> to vector<8x128xbf16>
      %cst_58 = arith.constant -1.000000e+30 : f32
      %138 = vector.broadcast %cst_58 : f32 to vector<8x1xf32>
      %cst_59 = arith.constant 0.000000e+00 : f32
      %139 = vector.broadcast %cst_59 : f32 to vector<8x1xf32>
      %cst_60 = arith.constant 0.000000e+00 : f32
      %140 = vector.broadcast %cst_60 : f32 to vector<8x128xf32>
      %c0_i32_61 = arith.constant 0 : i32
      %c8_i32_62 = arith.constant 8 : i32
      %141 = arith.muli %c0_i32_61, %c8_i32_62 : i32
      %142 = tpu.assume_multiple %141, 8 : i32
      %143 = arith.index_cast %142 : i32 to index
      %c0_63 = arith.constant 0 : index
      %144 = vector.load %arg19[%143, %c0_63] : memref<8x32xbf16, #tpu.memory_space<vmem>>, vector<8x32xbf16>
      %c0_64 = arith.constant 0 : index
      %145 = arith.index_cast %129 : i32 to index
      %146 = vector.load %arg7[%c0_64, %145] : memref<32x512xbf16, #tpu.memory_space<vmem>>, vector<32x128xbf16>
      %cst_65 = arith.constant dense<0.000000e+00> : vector<8x128xf32>
      %147 = tpu.matmul %144, %146, %cst_65 {dimension_numbers = #tpu.dot_dimension_numbers<[1], [0], [0], [1], [0, 0, 1, 1], [], []>} : vector<8x32xbf16>, vector<32x128xbf16>, vector<8x128xf32> -> vector<8x128xf32>
      %c0_66 = arith.constant 0 : index
      %148 = arith.index_cast %129 : i32 to index
      %149 = vector.load %arg10[%c0_66, %148] : memref<1x512xf32, #tpu.memory_space<vmem>>, vector<1x128xf32>
      %150 = vector.broadcast %149 : vector<1x128xf32> to vector<8x128xf32>
      %151 = arith.addf %147, %150 : vector<8x128xf32>
      %152 = arith.truncf %151 : vector<8x128xf32> to vector<8x128xbf16>
      %c0_67 = arith.constant 0 : index
      %153 = arith.index_cast %129 : i32 to index
      %154 = vector.load %arg8[%c0_67, %153] : memref<32x512xbf16, #tpu.memory_space<vmem>>, vector<32x128xbf16>
      %cst_68 = arith.constant dense<0.000000e+00> : vector<8x128xf32>
      %155 = tpu.matmul %144, %154, %cst_68 {dimension_numbers = #tpu.dot_dimension_numbers<[1], [0], [0], [1], [0, 0, 1, 1], [], []>} : vector<8x32xbf16>, vector<32x128xbf16>, vector<8x128xf32> -> vector<8x128xf32>
      %c0_69 = arith.constant 0 : index
      %156 = arith.index_cast %129 : i32 to index
      %157 = vector.load %arg11[%c0_69, %156] : memref<1x512xf32, #tpu.memory_space<vmem>>, vector<1x128xf32>
      %158 = vector.broadcast %157 : vector<1x128xf32> to vector<8x128xf32>
      %159 = arith.addf %155, %158 : vector<8x128xf32>
      %160 = arith.truncf %159 : vector<8x128xf32> to vector<8x128xbf16>
      "tpu.trace_start"() <{level = 10 : i32, message = "qd,kd->qk"}> : () -> ()
      %cst_70 = arith.constant dense<0.000000e+00> : vector<8x8xf32>
      %161 = tpu.matmul %137, %152, %cst_70 {dimension_numbers = #tpu.dot_dimension_numbers<[1], [1], [0], [0], [0, 0, 1, 0], [], []>} : vector<8x128xbf16>, vector<8x128xbf16>, vector<8x8xf32> -> vector<8x8xf32>
      "tpu.trace_stop"() : () -> ()
      %cst_71 = arith.constant 0.353553385 : f32
      %162 = vector.broadcast %cst_71 : f32 to vector<8x8xf32>
      %163 = arith.mulf %161, %162 : vector<8x8xf32>
      %cst_72 = arith.constant dense<0xFF800000> : vector<8xf32>
      %164 = vector.multi_reduction <maximumf>, %163, %cst_72 [1] : vector<8x8xf32> to vector<8xf32>
      %165 = vector.shape_cast %164 : vector<8xf32> to vector<8x1xf32>
      %166 = arith.maximumf %138, %165 : vector<8x1xf32>
      %167 = arith.subf %138, %166 : vector<8x1xf32>
      %168 = math.exp %167 : vector<8x1xf32>
      %169 = vector.broadcast %166 : vector<8x1xf32> to vector<8x8xf32>
      %170 = arith.subf %163, %169 : vector<8x8xf32>
      %171 = math.exp %170 : vector<8x8xf32>
      %172 = arith.mulf %168, %139 : vector<8x1xf32>
      %cst_73 = arith.constant dense<0.000000e+00> : vector<8xf32>
      %173 = vector.multi_reduction <add>, %171, %cst_73 [1] : vector<8x8xf32> to vector<8xf32>
      %174 = vector.shape_cast %173 : vector<8xf32> to vector<8x1xf32>
      %175 = arith.addf %172, %174 : vector<8x1xf32>
      %176 = vector.broadcast %168 : vector<8x1xf32> to vector<8x128xf32>
      %177 = arith.mulf %176, %140 : vector<8x128xf32>
      %178 = arith.truncf %171 : vector<8x8xf32> to vector<8x8xbf16>
      %cst_74 = arith.constant dense<0.000000e+00> : vector<8x128xf32>
      %179 = tpu.matmul %178, %160, %cst_74 {dimension_numbers = #tpu.dot_dimension_numbers<[1], [0], [0], [1], [0, 0, 1, 1], [], []>} : vector<8x8xbf16>, vector<8x128xbf16>, vector<8x128xf32> -> vector<8x128xf32>
      %180 = arith.addf %177, %179 : vector<8x128xf32>
      %c1_i32_75 = arith.constant 1 : i32
      %181 = vector.broadcast %175 : vector<8x1xf32> to vector<8x128xf32>
      %182 = arith.divf %180, %181 : vector<8x128xf32>
      %183 = arith.truncf %182 : vector<8x128xf32> to vector<8x128xbf16>
      %c0_76 = arith.constant 0 : index
      %184 = arith.index_cast %129 : i32 to index
      %185 = vector.load %arg20[%c0_76, %184] : memref<8x512xbf16, #tpu.memory_space<vmem>>, vector<8x128xbf16>
      tpu.vector_store %arg20[%c0_76, %184], %183 {strides = array<i32>} : memref<8x512xbf16, #tpu.memory_space<vmem>>, vector<8x128xbf16>,
    }
    %c4_i32_19 = arith.constant 4 : i32
    %c0_20 = arith.constant 0 : index
    %c0_21 = arith.constant 0 : index
    %52 = vector.load %arg20[%c0_20, %c0_21] : memref<8x512xbf16, #tpu.memory_space<vmem>>, vector<8x512xbf16>
    %c0_22 = arith.constant 0 : index
    %c0_23 = arith.constant 0 : index
    %53 = vector.load %arg12[%c0_22, %c0_23] : memref<512x32xbf16, #tpu.memory_space<vmem>>, vector<512x32xbf16>
    %cst_24 = arith.constant dense<0.000000e+00> : vector<8x32xf32>
    %54 = tpu.matmul %52, %53, %cst_24 {dimension_numbers = #tpu.dot_dimension_numbers<[1], [0], [0], [1], [0, 0, 1, 1], [], []>} : vector<8x512xbf16>, vector<512x32xbf16>, vector<8x32xf32> -> vector<8x32xf32>
    %c0_25 = arith.constant 0 : index
    %c0_26 = arith.constant 0 : index
    %55 = vector.load %arg13[%c0_25, %c0_26] : memref<1x32xf32, #tpu.memory_space<vmem>>, vector<1x32xf32>
    %56 = vector.broadcast %55 : vector<1x32xf32> to vector<8x32xf32>
    %57 = arith.addf %54, %56 : vector<8x32xf32>
    %c0_27 = arith.constant 0 : index
    %58 = arith.index_cast %1 : i32 to index
    %c0_28 = arith.constant 0 : index
    %59 = vector.load %arg2[%c0_27, %58, %c0_28] : memref<1x8x32xf32, #tpu.memory_space<vmem>>, vector<1x8x32xf32>
    %60 = vector.shape_cast %59 : vector<1x8x32xf32> to vector<8x32xf32>
    %61 = vector.broadcast %17 : vector<1x32xf32> to vector<8x32xf32>
    %62 = arith.mulf %61, %57 : vector<8x32xf32>
    %63 = arith.addf %60, %62 : vector<8x32xf32>
    %cst_29 = arith.constant dense<0.000000e+00> : vector<8xf32>
    %64 = vector.multi_reduction <add>, %63, %cst_29 [1] : vector<8x32xf32> to vector<8xf32>
    %65 = vector.shape_cast %64 : vector<8xf32> to vector<8x1xf32>
    %cst_30 = arith.constant 3.200000e+01 : f32
    %66 = vector.broadcast %cst_30 : f32 to vector<8x1xf32>
    %67 = arith.divf %65, %66 : vector<8x1xf32>
    %68 = vector.broadcast %67 : vector<8x1xf32> to vector<8x32xf32>
    %69 = arith.subf %63, %68 : vector<8x32xf32>
    %70 = arith.mulf %69, %69 : vector<8x32xf32>
    %cst_31 = arith.constant dense<0.000000e+00> : vector<8xf32>
    %71 = vector.multi_reduction <add>, %70, %cst_31 [1] : vector<8x32xf32> to vector<8xf32>
    %72 = vector.shape_cast %71 : vector<8xf32> to vector<8x1xf32>
    %cst_32 = arith.constant 3.200000e+01 : f32
    %73 = vector.broadcast %cst_32 : f32 to vector<8x1xf32>
    %74 = arith.divf %72, %73 : vector<8x1xf32>
    %75 = vector.broadcast %67 : vector<8x1xf32> to vector<8x32xf32>
    %76 = arith.subf %63, %75 : vector<8x32xf32>
    %cst_33 = arith.constant 9.99999997E-7 : f32
    %77 = vector.broadcast %cst_33 : f32 to vector<8x1xf32>
    %78 = arith.addf %74, %77 : vector<8x1xf32>
    %79 = math.rsqrt %78 : vector<8x1xf32>
    %80 = vector.broadcast %79 : vector<8x1xf32> to vector<8x32xf32>
    %81 = arith.mulf %76, %80 : vector<8x32xf32>
    %cst_34 = arith.constant 1.000000e+00 : f32
    %82 = vector.broadcast %cst_34 : f32 to vector<1x32xf32>
    %83 = arith.addf %82, %19 : vector<1x32xf32>
    %84 = vector.broadcast %83 : vector<1x32xf32> to vector<8x32xf32>
    %85 = arith.mulf %81, %84 : vector<8x32xf32>
    %86 = vector.broadcast %18 : vector<1x32xf32> to vector<8x32xf32>
    %87 = arith.addf %85, %86 : vector<8x32xf32>
    %88 = arith.truncf %87 : vector<8x32xf32> to vector<8x32xbf16>
    %cst_35 = arith.constant 0.000000e+00 : f32
    %89 = vector.broadcast %cst_35 : f32 to vector<8x32xf32>
    %c0_i32_36 = arith.constant 0 : i32
    %c128_i32 = arith.constant 128 : i32
    %90 = arith.muli %c0_i32_36, %c128_i32 : i32
    %91 = tpu.assume_multiple %90, 128 : i32
    %c0_37 = arith.constant 0 : index
    %92 = arith.index_cast %91 : i32 to index
    %93 = vector.load %arg14[%c0_37, %92] : memref<32x128xbf16, #tpu.memory_space<vmem>>, vector<32x128xbf16>
    %cst_38 = arith.constant dense<0.000000e+00> : vector<8x128xf32>
    %94 = tpu.matmul %88, %93, %cst_38 {dimension_numbers = #tpu.dot_dimension_numbers<[1], [0], [0], [1], [0, 0, 1, 1], [], []>} : vector<8x32xbf16>, vector<32x128xbf16>, vector<8x128xf32> -> vector<8x128xf32>
    %c0_39 = arith.constant 0 : index
    %95 = arith.index_cast %91 : i32 to index
    %96 = vector.load %arg15[%c0_39, %95] : memref<1x128xf32, #tpu.memory_space<vmem>>, vector<1x128xf32>
    %97 = vector.broadcast %96 : vector<1x128xf32> to vector<8x128xf32>
    %98 = arith.addf %94, %97 : vector<8x128xf32>
    %99 = arith.mulf %98, %98 : vector<8x128xf32>
    %100 = arith.mulf %98, %99 : vector<8x128xf32>
    %cst_40 = arith.constant 4.471500e-02 : f32
    %101 = vector.broadcast %cst_40 : f32 to vector<8x128xf32>
    %102 = arith.mulf %101, %100 : vector<8x128xf32>
    %103 = arith.addf %98, %102 : vector<8x128xf32>
    %cst_41 = arith.constant 0.797884583 : f32
    %104 = vector.broadcast %cst_41 : f32 to vector<8x128xf32>
    %105 = arith.mulf %104, %103 : vector<8x128xf32>
    %106 = math.tanh %105 : vector<8x128xf32>
    %cst_42 = arith.constant 1.000000e+00 : f32
    %107 = vector.broadcast %cst_42 : f32 to vector<8x128xf32>
    %108 = arith.addf %107, %106 : vector<8x128xf32>
    %cst_43 = arith.constant 5.000000e-01 : f32
    %109 = vector.broadcast %cst_43 : f32 to vector<8x128xf32>
    %110 = arith.mulf %109, %108 : vector<8x128xf32>
    %111 = arith.mulf %98, %110 : vector<8x128xf32>
    %112 = arith.truncf %111 : vector<8x128xf32> to vector<8x128xbf16>
    %113 = arith.index_cast %91 : i32 to index
    %c0_44 = arith.constant 0 : index
    %114 = vector.load %arg16[%113, %c0_44] : memref<128x32xbf16, #tpu.memory_space<vmem>>, vector<128x32xbf16>
    %cst_45 = arith.constant dense<0.000000e+00> : vector<8x32xf32>
    %115 = tpu.matmul %112, %114, %cst_45 {dimension_numbers = #tpu.dot_dimension_numbers<[1], [0], [0], [1], [0, 0, 1, 1], [], []>} : vector<8x128xbf16>, vector<128x32xbf16>, vector<8x32xf32> -> vector<8x32xf32>
    %116 = arith.addf %89, %115 : vector<8x32xf32>
    %c1_i32_46 = arith.constant 1 : i32
    %c0_47 = arith.constant 0 : index
    %c0_48 = arith.constant 0 : index
    %117 = vector.load %arg17[%c0_47, %c0_48] : memref<1x32xf32, #tpu.memory_space<vmem>>, vector<1x32xf32>
    %118 = vector.broadcast %117 : vector<1x32xf32> to vector<8x32xf32>
    %119 = arith.addf %116, %118 : vector<8x32xf32>
    %120 = vector.broadcast %20 : vector<1x32xf32> to vector<8x32xf32>
    %121 = arith.mulf %120, %119 : vector<8x32xf32>
    %122 = arith.addf %63, %121 : vector<8x32xf32>
    %c0_49 = arith.constant 0 : index
    %c0_50 = arith.constant 0 : index
    %c0_51 = arith.constant 0 : index
    %123 = vector.load %arg18[%c0_49, %c0_50, %c0_51] : memref<1x8x32xf32, #tpu.memory_space<vmem>>, vector<1x8x32xf32>
    %124 = vector.shape_cast %123 : vector<1x8x32xf32> to vector<8x32xf32>
    %125 = vector.shape_cast %122 : vector<8x32xf32> to vector<1x8x32xf32>
    tpu.vector_store %arg18[%c0_49, %c0_50, %c0_51], %125 {strides = array<i32>} : memref<1x8x32xf32, #tpu.memory_space<vmem>>, vector<1x8x32xf32>,
    return
  }
  func.func @transform_0(%arg0: i32, %arg1: i32) -> (i32, i32, i32) {
    %c0_i32 = arith.constant 0 : i32
    %c0_i32_0 = arith.constant 0 : i32
    %c0_i32_1 = arith.constant 0 : i32
    return %arg0, %c0_i32, %c0_i32_0 : i32, i32, i32
  }
  func.func @transform_1(%arg0: i32, %arg1: i32) -> (i32, i32, i32) {
    %c0_i32 = arith.constant 0 : i32
    %c0_i32_0 = arith.constant 0 : i32
    %c0_i32_1 = arith.constant 0 : i32
    return %arg0, %c0_i32, %c0_i32_0 : i32, i32, i32
  }
  func.func @transform_2(%arg0: i32, %arg1: i32) -> (i32, i32) {
    %c0_i32 = arith.constant 0 : i32
    %c0_i32_0 = arith.constant 0 : i32
    %c0_i32_1 = arith.constant 0 : i32
    return %c0_i32, %c0_i32_0 : i32, i32
  }
  func.func @transform_3(%arg0: i32, %arg1: i32) -> (i32, i32) {
    %c0_i32 = arith.constant 0 : i32
    %c0_i32_0 = arith.constant 0 : i32
    %c0_i32_1 = arith.constant 0 : i32
    return %c0_i32, %c0_i32_0 : i32, i32
  }
  func.func @transform_4(%arg0: i32, %arg1: i32) -> (i32, i32) {
    %c0_i32 = arith.constant 0 : i32
    %c0_i32_0 = arith.constant 0 : i32
    %c0_i32_1 = arith.constant 0 : i32
    return %c0_i32, %c0_i32_0 : i32, i32
  }
  func.func @transform_5(%arg0: i32, %arg1: i32) -> (i32, i32) {
    %c0_i32 = arith.constant 0 : i32
    %c0_i32_0 = arith.constant 0 : i32
    %c0_i32_1 = arith.constant 0 : i32
    return %c0_i32, %c0_i32_0 : i32, i32
  }
  func.func @transform_6(%arg0: i32, %arg1: i32) -> (i32, i32) {
    %c0_i32 = arith.constant 0 : i32
    %c0_i32_0 = arith.constant 0 : i32
    %c0_i32_1 = arith.constant 0 : i32
    return %c0_i32, %c0_i32_0 : i32, i32
  }
  func.func @transform_7(%arg0: i32, %arg1: i32) -> (i32, i32) {
    %c0_i32 = arith.constant 0 : i32
    %c0_i32_0 = arith.constant 0 : i32
    %c0_i32_1 = arith.constant 0 : i32
    return %c0_i32, %c0_i32_0 : i32, i32
  }
  func.func @transform_8(%arg0: i32, %arg1: i32) -> (i32, i32) {
    %c0_i32 = arith.constant 0 : i32
    %c0_i32_0 = arith.constant 0 : i32
    %c0_i32_1 = arith.constant 0 : i32
    return %c0_i32, %c0_i32_0 : i32, i32
  }
  func.func @transform_9(%arg0: i32, %arg1: i32) -> (i32, i32) {
    %c0_i32 = arith.constant 0 : i32
    %c0_i32_0 = arith.constant 0 : i32
    %c0_i32_1 = arith.constant 0 : i32
    return %c0_i32, %c0_i32_0 : i32, i32
  }
  func.func @transform_10(%arg0: i32, %arg1: i32) -> (i32, i32) {
    %c0_i32 = arith.constant 0 : i32
    %c0_i32_0 = arith.constant 0 : i32
    %c0_i32_1 = arith.constant 0 : i32
    return %c0_i32, %c0_i32_0 : i32, i32
  }
  func.func @transform_11(%arg0: i32, %arg1: i32) -> (i32, i32) {
    %c0_i32 = arith.constant 0 : i32
    %c0_i32_0 = arith.constant 0 : i32
    %c0_i32_1 = arith.constant 0 : i32
    return %c0_i32, %c0_i32_0 : i32, i32
  }
  func.func @transform_12(%arg0: i32, %arg1: i32) -> (i32, i32) {
    %c0_i32 = arith.constant 0 : i32
    %c0_i32_0 = arith.constant 0 : i32
    %c0_i32_1 = arith.constant 0 : i32
    return %c0_i32, %c0_i32_0 : i32, i32
  }
  func.func @transform_13(%arg0: i32, %arg1: i32) -> (i32, i32) {
    %c0_i32 = arith.constant 0 : i32
    %c0_i32_0 = arith.constant 0 : i32
    %c0_i32_1 = arith.constant 0 : i32
    return %c0_i32, %c0_i32_0 : i32, i32
  }
  func.func @transform_14(%arg0: i32, %arg1: i32) -> (i32, i32) {
    %c0_i32 = arith.constant 0 : i32
    %c0_i32_0 = arith.constant 0 : i32
    %c0_i32_1 = arith.constant 0 : i32
    return %c0_i32, %c0_i32_0 : i32, i32
  }
  func.func @transform_15(%arg0: i32, %arg1: i32) -> (i32, i32) {
    %c0_i32 = arith.constant 0 : i32
    %c0_i32_0 = arith.constant 0 : i32
    %c0_i32_1 = arith.constant 0 : i32
    return %c0_i32, %c0_i32_0 : i32, i32
  }
  func.func @transform_16(%arg0: i32, %arg1: i32) -> (i32, i32, i32) {
    %c0_i32 = arith.constant 0 : i32
    %c0_i32_0 = arith.constant 0 : i32
    return %arg0, %arg1, %c0_i32 : i32, i32, i32
  }
}

module attributes {stable_mosaic.version = 11 : i64} {
  func.func @_dit_block_kernel(%arg0: i32, %arg1: i32, %arg2: memref<1x8x32xf32, #tpu.memory_space<vmem>>, %arg3: memref<1x1x32xf32, #tpu.memory_space<vmem>>, %arg4: memref<32x192xbf16, #tpu.memory_space<vmem>>, %arg5: memref<1x192xf32, #tpu.memory_space<vmem>>, %arg6: memref<32x512xbf16, #tpu.memory_space<vmem>>, %arg7: memref<32x512xbf16, #tpu.memory_space<vmem>>, %arg8: memref<32x512xbf16, #tpu.memory_space<vmem>>, %arg9: memref<1x512xf32, #tpu.memory_space<vmem>>, %arg10: memref<1x512xf32, #tpu.memory_space<vmem>>, %arg11: memref<1x512xf32, #tpu.memory_space<vmem>>, %arg12: memref<512x32xbf16, #tpu.memory_space<vmem>>, %arg13: memref<1x32xf32, #tpu.memory_space<vmem>>, %arg14: memref<32x128xbf16, #tpu.memory_space<vmem>>, %arg15: memref<1x128xf32, #tpu.memory_space<vmem>>, %arg16: memref<128x32xbf16, #tpu.memory_space<vmem>>, %arg17: memref<1x32xf32, #tpu.memory_space<vmem>>, %arg18: memref<1x8x32xf32, #tpu.memory_space<vmem>>, %arg19: memref<8x32xbf16, #tpu.memory_space<vmem>>, %arg20: memref<8x512xbf16, #tpu.memory_space<vmem>>) attributes {dimension_semantics = [#tpu.dimension_semantics<parallel>, #tpu.dimension_semantics<parallel>], iteration_bounds = array<i64: 2, 1>, scalar_prefetch = 0 : i64, scratch_operands = 2 : i64, tpu.core_type = #tpu.core_type<tc>, window_params = [{transform_indices = @transform_0, window_bounds = array<i64: 1, 8, 32>}, {transform_indices = @transform_1, window_bounds = array<i64: 1, 1, 32>}, {pipeline_mode = #tpu.pipeline_mode<synchronous>, transform_indices = @transform_2, window_bounds = array<i64: 32, 192>}, {pipeline_mode = #tpu.pipeline_mode<synchronous>, transform_indices = @transform_3, window_bounds = array<i64: 1, 192>}, {pipeline_mode = #tpu.pipeline_mode<synchronous>, transform_indices = @transform_4, window_bounds = array<i64: 32, 512>}, {pipeline_mode = #tpu.pipeline_mode<synchronous>, transform_indices = @transform_5, window_bounds = array<i64: 32, 512>}, {pipeline_mode = #tpu.pipeline_mode<synchronous>, transform_indices = @transform_6, window_bounds = array<i64: 32, 512>}, {pipeline_mode = #tpu.pipeline_mode<synchronous>, transform_indices = @transform_7, window_bounds = array<i64: 1, 512>}, {pipeline_mode = #tpu.pipeline_mode<synchronous>, transform_indices = @transform_8, window_bounds = array<i64: 1, 512>}, {pipeline_mode = #tpu.pipeline_mode<synchronous>, transform_indices = @transform_9, window_bounds = array<i64: 1, 512>}, {pipeline_mode = #tpu.pipeline_mode<synchronous>, transform_indices = @transform_10, window_bounds = array<i64: 512, 32>}, {pipeline_mode = #tpu.pipeline_mode<synchronous>, transform_indices = @transform_11, window_bounds = array<i64: 1, 32>}, {pipeline_mode = #tpu.pipeline_mode<synchronous>, transform_indices = @transform_12, window_bounds = array<i64: 32, 128>}, {pipeline_mode = #tpu.pipeline_mode<synchronous>, transform_indices = @transform_13, window_bounds = array<i64: 1, 128>}, {pipeline_mode = #tpu.pipeline_mode<synchronous>, transform_indices = @transform_14, window_bounds = array<i64: 128, 32>}, {pipeline_mode = #tpu.pipeline_mode<synchronous>, transform_indices = @transform_15, window_bounds = array<i64: 1, 32>}, {transform_indices = @transform_16, window_bounds = array<i64: 1, 8, 32>}]} {
    %c8_i32 = arith.constant 8 : i32
    %0 = arith.muli %arg1, %c8_i32 : i32
    %1 = tpu.assume_multiple %0, 8 : i32
    %c0 = arith.constant 0 : index
    %c0_0 = arith.constant 0 : index
    %c0_1 = arith.constant 0 : index
    %2 = vector.load %arg3[%c0, %c0_0, %c0_1] : memref<1x1x32xf32, #tpu.memory_space<vmem>>, vector<1x1x32xf32>
    %3 = vector.shape_cast %2 : vector<1x1x32xf32> to vector<1x32xf32>
    %4 = arith.negf %3 : vector<1x32xf32>
    %5 = math.exp %4 : vector<1x32xf32>
    %cst = arith.constant 1.000000e+00 : f32
    %6 = vector.broadcast %cst : f32 to vector<1x32xf32>
    %7 = arith.addf %6, %5 : vector<1x32xf32>
    %8 = arith.divf %6, %7 : vector<1x32xf32>
    %9 = arith.mulf %3, %8 : vector<1x32xf32>
    %10 = arith.truncf %9 : vector<1x32xf32> to vector<1x32xbf16>
    %c0_2 = arith.constant 0 : index
    %c0_3 = arith.constant 0 : index
    %11 = vector.load %arg4[%c0_2, %c0_3] : memref<32x192xbf16, #tpu.memory_space<vmem>>, vector<32x192xbf16>
    %cst_4 = arith.constant dense<0.000000e+00> : vector<1x192xf32>
    %12 = tpu.matmul %10, %11, %cst_4 {dimension_numbers = #tpu.dot_dimension_numbers<[1], [0], [0], [1], [0, 0, 1, 1], [], []>} : vector<1x32xbf16>, vector<32x192xbf16>, vector<1x192xf32> -> vector<1x192xf32>
    %c0_5 = arith.constant 0 : index
    %c0_6 = arith.constant 0 : index
    %13 = vector.load %arg5[%c0_5, %c0_6] : memref<1x192xf32, #tpu.memory_space<vmem>>, vector<1x192xf32>
    %14 = arith.addf %12, %13 : vector<1x192xf32>
    %15 = vector.extract_strided_slice %14 {offsets = [0, 0], sizes = [1, 32], strides = [1, 1]} : vector<1x192xf32> to vector<1x32xf32>
    %16 = vector.extract_strided_slice %14 {offsets = [0, 32], sizes = [1, 32], strides = [1, 1]} : vector<1x192xf32> to vector<1x32xf32>
    %17 = vector.extract_strided_slice %14 {offsets = [0, 64], sizes = [1, 32], strides = [1, 1]} : vector<1x192xf32> to vector<1x32xf32>
    %18 = vector.extract_strided_slice %14 {offsets = [0, 96], sizes = [1, 32], strides = [1, 1]} : vector<1x192xf32> to vector<1x32xf32>
    %19 = vector.extract_strided_slice %14 {offsets = [0, 128], sizes = [1, 32], strides = [1, 1]} : vector<1x192xf32> to vector<1x32xf32>
    %20 = vector.extract_strided_slice %14 {offsets = [0, 160], sizes = [1, 32], strides = [1, 1]} : vector<1x192xf32> to vector<1x32xf32>
    %c0_7 = arith.constant 0 : index
    %c0_8 = arith.constant 0 : index
    %c0_9 = arith.constant 0 : index
    %21 = vector.load %arg2[%c0_7, %c0_8, %c0_9] : memref<1x8x32xf32, #tpu.memory_space<vmem>>, vector<1x8x32xf32>
    %22 = vector.shape_cast %21 : vector<1x8x32xf32> to vector<8x32xf32>
    %cst_10 = arith.constant dense<0.000000e+00> : vector<8xf32>
    %23 = vector.multi_reduction <add>, %22, %cst_10 [1] : vector<8x32xf32> to vector<8xf32>
    %24 = vector.shape_cast %23 : vector<8xf32> to vector<8x1xf32>
    %cst_11 = arith.constant 3.200000e+01 : f32
    %25 = vector.broadcast %cst_11 : f32 to vector<8x1xf32>
    %26 = arith.divf %24, %25 : vector<8x1xf32>
    %27 = vector.broadcast %26 : vector<8x1xf32> to vector<8x32xf32>
    %28 = arith.subf %22, %27 : vector<8x32xf32>
    %29 = arith.mulf %28, %28 : vector<8x32xf32>
    %cst_12 = arith.constant dense<0.000000e+00> : vector<8xf32>
    %30 = vector.multi_reduction <add>, %29, %cst_12 [1] : vector<8x32xf32> to vector<8xf32>
    %31 = vector.shape_cast %30 : vector<8xf32> to vector<8x1xf32>
    %cst_13 = arith.constant 3.200000e+01 : f32
    %32 = vector.broadcast %cst_13 : f32 to vector<8x1xf32>
    %33 = arith.divf %31, %32 : vector<8x1xf32>
    %34 = vector.broadcast %26 : vector<8x1xf32> to vector<8x32xf32>
    %35 = arith.subf %22, %34 : vector<8x32xf32>
    %cst_14 = arith.constant 9.99999997E-7 : f32
    %36 = vector.broadcast %cst_14 : f32 to vector<8x1xf32>
    %37 = arith.addf %33, %36 : vector<8x1xf32>
    %38 = math.rsqrt %37 : vector<8x1xf32>
    %39 = vector.broadcast %38 : vector<8x1xf32> to vector<8x32xf32>
    %40 = arith.mulf %35, %39 : vector<8x32xf32>
    %cst_15 = arith.constant 1.000000e+00 : f32
    %41 = vector.broadcast %cst_15 : f32 to vector<1x32xf32>
    %42 = arith.addf %41, %16 : vector<1x32xf32>
    %43 = vector.broadcast %42 : vector<1x32xf32> to vector<8x32xf32>
    %44 = arith.mulf %40, %43 : vector<8x32xf32>
    %45 = vector.broadcast %15 : vector<1x32xf32> to vector<8x32xf32>
    %46 = arith.addf %44, %45 : vector<8x32xf32>
    %47 = arith.truncf %46 : vector<8x32xf32> to vector<8x32xbf16>
    %c0_16 = arith.constant 0 : index
    %c0_17 = arith.constant 0 : index
    %48 = vector.load %arg19[%c0_16, %c0_17] : memref<8x32xbf16, #tpu.memory_space<vmem>>, vector<8x32xbf16>
    tpu.vector_store %arg19[%c0_16, %c0_17], %47 {strides = array<i32>} : memref<8x32xbf16, #tpu.memory_space<vmem>>, vector<8x32xbf16>,
    %49 = arith.index_cast %1 : i32 to index
    %c0_18 = arith.constant 0 : index
    %50 = vector.load %arg19[%49, %c0_18] : memref<8x32xbf16, #tpu.memory_space<vmem>>, vector<8x32xbf16>
    %c0_i32 = arith.constant 0 : i32
    %c4_i32 = arith.constant 4 : i32
    %51 = arith.addi %c0_i32, %c4_i32 : i32
    %c1_i32 = arith.constant 1 : i32
    scf.for %arg21 = %c0_i32 to %51 step %c1_i32  : i32 {
      %c1_i32_52 = arith.constant 1 : i32
      %126 = arith.muli %arg21, %c1_i32_52 : i32
      %c0_i32_53 = arith.constant 0 : i32
      %127 = arith.addi %c0_i32_53, %126 : i32
      %c128_i32_54 = arith.constant 128 : i32
      %128 = arith.muli %127, %c128_i32_54 : i32
      %129 = tpu.assume_multiple %128, 128 : i32
      %c0_55 = arith.constant 0 : index
      %130 = arith.index_cast %129 : i32 to index
      %131 = vector.load %arg6[%c0_55, %130] : memref<32x512xbf16, #tpu.memory_space<vmem>>, vector<32x128xbf16>
      %cst_56 = arith.constant dense<0.000000e+00> : vector<8x128xf32>
      %132 = tpu.matmul %50, %131, %cst_56 {dimension_numbers = #tpu.dot_dimension_numbers<[1], [0], [0], [1], [0, 0, 1, 1], [], []>} : vector<8x32xbf16>, vector<32x128xbf16>, vector<8x128xf32> -> vector<8x128xf32>
      %c0_57 = arith.constant 0 : index
      %133 = arith.index_cast %129 : i32 to index
      %134 = vector.load %arg9[%c0_57, %133] : memref<1x512xf32, #tpu.memory_space<vmem>>, vector<1x128xf32>
      %135 = vector.broadcast %134 : vector<1x128xf32> to vector<8x128xf32>
      %136 = arith.addf %132, %135 : vector<8x128xf32>
      %137 = arith.truncf %136 : vector<8x128xf32> to vector<8x128xbf16>
      %cst_58 = arith.constant -1.000000e+30 : f32
      %138 = vector.broadcast %cst_58 : f32 to vector<8x1xf32>
      %cst_59 = arith.constant 0.000000e+00 : f32
      %139 = vector.broadcast %cst_59 : f32 to vector<8x1xf32>
      %cst_60 = arith.constant 0.000000e+00 : f32
      %140 = vector.broadcast %cst_60 : f32 to vector<8x128xf32>
      %c0_i32_61 = arith.constant 0 : i32
      %c8_i32_62 = arith.constant 8 : i32
      %141 = arith.muli %c0_i32_61, %c8_i32_62 : i32
      %142 = tpu.assume_multiple %141, 8 : i32
      %143 = arith.index_cast %142 : i32 to index
      %c0_63 = arith.constant 0 : index
      %144 = vector.load %arg19[%143, %c0_63] : memref<8x32xbf16, #tpu.memory_space<vmem>>, vector<8x32xbf16>
      %c0_64 = arith.constant 0 : index
      %145 = arith.index_cast %129 : i32 to index
      %146 = vector.load %arg7[%c0_64, %145] : memref<32x512xbf16, #tpu.memory_space<vmem>>, vector<32x128xbf16>
      %cst_65 = arith.constant dense<0.000000e+00> : vector<8x128xf32>
      %147 = tpu.matmul %144, %146, %cst_65 {dimension_numbers = #tpu.dot_dimension_numbers<[1], [0], [0], [1], [0, 0, 1, 1], [], []>} : vector<8x32xbf16>, vector<32x128xbf16>, vector<8x128xf32> -> vector<8x128xf32>
      %c0_66 = arith.constant 0 : index
      %148 = arith.index_cast %129 : i32 to index
      %149 = vector.load %arg10[%c0_66, %148] : memref<1x512xf32, #tpu.memory_space<vmem>>, vector<1x128xf32>
      %150 = vector.broadcast %149 : vector<1x128xf32> to vector<8x128xf32>
      %151 = arith.addf %147, %150 : vector<8x128xf32>
      %152 = arith.truncf %151 : vector<8x128xf32> to vector<8x128xbf16>
      %c0_67 = arith.constant 0 : index
      %153 = arith.index_cast %129 : i32 to index
      %154 = vector.load %arg8[%c0_67, %153] : memref<32x512xbf16, #tpu.memory_space<vmem>>, vector<32x128xbf16>
      %cst_68 = arith.constant dense<0.000000e+00> : vector<8x128xf32>
      %155 = tpu.matmul %144, %154, %cst_68 {dimension_numbers = #tpu.dot_dimension_numbers<[1], [0], [0], [1], [0, 0, 1, 1], [], []>} : vector<8x32xbf16>, vector<32x128xbf16>, vector<8x128xf32> -> vector<8x128xf32>
      %c0_69 = arith.constant 0 : index
      %156 = arith.index_cast %129 : i32 to index
      %157 = vector.load %arg11[%c0_69, %156] : memref<1x512xf32, #tpu.memory_space<vmem>>, vector<1x128xf32>
      %158 = vector.broadcast %157 : vector<1x128xf32> to vector<8x128xf32>
      %159 = arith.addf %155, %158 : vector<8x128xf32>
      %160 = arith.truncf %159 : vector<8x128xf32> to vector<8x128xbf16>
      "tpu.trace_start"() <{level = 10 : i32, message = "qd,kd->qk"}> : () -> ()
      %cst_70 = arith.constant dense<0.000000e+00> : vector<8x8xf32>
      %161 = tpu.matmul %137, %152, %cst_70 {dimension_numbers = #tpu.dot_dimension_numbers<[1], [1], [0], [0], [0, 0, 1, 0], [], []>} : vector<8x128xbf16>, vector<8x128xbf16>, vector<8x8xf32> -> vector<8x8xf32>
      "tpu.trace_stop"() : () -> ()
      %cst_71 = arith.constant 0.353553385 : f32
      %162 = vector.broadcast %cst_71 : f32 to vector<8x8xf32>
      %163 = arith.mulf %161, %162 : vector<8x8xf32>
      %cst_72 = arith.constant dense<0xFF800000> : vector<8xf32>
      %164 = vector.multi_reduction <maximumf>, %163, %cst_72 [1] : vector<8x8xf32> to vector<8xf32>
      %165 = vector.shape_cast %164 : vector<8xf32> to vector<8x1xf32>
      %166 = arith.maximumf %138, %165 : vector<8x1xf32>
      %167 = arith.subf %138, %166 : vector<8x1xf32>
      %168 = math.exp %167 : vector<8x1xf32>
      %169 = vector.broadcast %166 : vector<8x1xf32> to vector<8x8xf32>
      %170 = arith.subf %163, %169 : vector<8x8xf32>
      %171 = math.exp %170 : vector<8x8xf32>
      %172 = arith.mulf %168, %139 : vector<8x1xf32>
      %cst_73 = arith.constant dense<0.000000e+00> : vector<8xf32>
      %173 = vector.multi_reduction <add>, %171, %cst_73 [1] : vector<8x8xf32> to vector<8xf32>
      %174 = vector.shape_cast %173 : vector<8xf32> to vector<8x1xf32>
      %175 = arith.addf %172, %174 : vector<8x1xf32>
      %176 = vector.broadcast %168 : vector<8x1xf32> to vector<8x128xf32>
      %177 = arith.mulf %176, %140 : vector<8x128xf32>
      %178 = arith.truncf %171 : vector<8x8xf32> to vector<8x8xbf16>
      %cst_74 = arith.constant dense<0.000000e+00> : vector<8x128xf32>
      %179 = tpu.matmul %178, %160, %cst_74 {dimension_numbers = #tpu.dot_dimension_numbers<[1], [0], [0], [1], [0, 0, 1, 1], [], []>} : vector<8x8xbf16>, vector<8x128xbf16>, vector<8x128xf32> -> vector<8x128xf32>
      %180 = arith.addf %177, %179 : vector<8x128xf32>
      %c1_i32_75 = arith.constant 1 : i32
      %181 = vector.broadcast %175 : vector<8x1xf32> to vector<8x128xf32>
      %182 = arith.divf %180, %181 : vector<8x128xf32>
      %183 = arith.truncf %182 : vector<8x128xf32> to vector<8x128xbf16>
      %c0_76 = arith.constant 0 : index
      %184 = arith.index_cast %129 : i32 to index
      %185 = vector.load %arg20[%c0_76, %184] : memref<8x512xbf16, #tpu.memory_space<vmem>>, vector<8x128xbf16>
      tpu.vector_store %arg20[%c0_76, %184], %183 {strides = array<i32>} : memref<8x512xbf16, #tpu.memory_space<vmem>>, vector<8x128xbf16>,
    }
    %c4_i32_19 = arith.constant 4 : i32
    %c0_20 = arith.constant 0 : index
    %c0_21 = arith.constant 0 : index
    %52 = vector.load %arg20[%c0_20, %c0_21] : memref<8x512xbf16, #tpu.memory_space<vmem>>, vector<8x512xbf16>
    %c0_22 = arith.constant 0 : index
    %c0_23 = arith.constant 0 : index
    %53 = vector.load %arg12[%c0_22, %c0_23] : memref<512x32xbf16, #tpu.memory_space<vmem>>, vector<512x32xbf16>
    %cst_24 = arith.constant dense<0.000000e+00> : vector<8x32xf32>
    %54 = tpu.matmul %52, %53, %cst_24 {dimension_numbers = #tpu.dot_dimension_numbers<[1], [0], [0], [1], [0, 0, 1, 1], [], []>} : vector<8x512xbf16>, vector<512x32xbf16>, vector<8x32xf32> -> vector<8x32xf32>
    %c0_25 = arith.constant 0 : index
    %c0_26 = arith.constant 0 : index
    %55 = vector.load %arg13[%c0_25, %c0_26] : memref<1x32xf32, #tpu.memory_space<vmem>>, vector<1x32xf32>
    %56 = vector.broadcast %55 : vector<1x32xf32> to vector<8x32xf32>
    %57 = arith.addf %54, %56 : vector<8x32xf32>
    %c0_27 = arith.constant 0 : index
    %58 = arith.index_cast %1 : i32 to index
    %c0_28 = arith.constant 0 : index
    %59 = vector.load %arg2[%c0_27, %58, %c0_28] : memref<1x8x32xf32, #tpu.memory_space<vmem>>, vector<1x8x32xf32>
    %60 = vector.shape_cast %59 : vector<1x8x32xf32> to vector<8x32xf32>
    %61 = vector.broadcast %17 : vector<1x32xf32> to vector<8x32xf32>
    %62 = arith.mulf %61, %57 : vector<8x32xf32>
    %63 = arith.addf %60, %62 : vector<8x32xf32>
    %cst_29 = arith.constant dense<0.000000e+00> : vector<8xf32>
    %64 = vector.multi_reduction <add>, %63, %cst_29 [1] : vector<8x32xf32> to vector<8xf32>
    %65 = vector.shape_cast %64 : vector<8xf32> to vector<8x1xf32>
    %cst_30 = arith.constant 3.200000e+01 : f32
    %66 = vector.broadcast %cst_30 : f32 to vector<8x1xf32>
    %67 = arith.divf %65, %66 : vector<8x1xf32>
    %68 = vector.broadcast %67 : vector<8x1xf32> to vector<8x32xf32>
    %69 = arith.subf %63, %68 : vector<8x32xf32>
    %70 = arith.mulf %69, %69 : vector<8x32xf32>
    %cst_31 = arith.constant dense<0.000000e+00> : vector<8xf32>
    %71 = vector.multi_reduction <add>, %70, %cst_31 [1] : vector<8x32xf32> to vector<8xf32>
    %72 = vector.shape_cast %71 : vector<8xf32> to vector<8x1xf32>
    %cst_32 = arith.constant 3.200000e+01 : f32
    %73 = vector.broadcast %cst_32 : f32 to vector<8x1xf32>
    %74 = arith.divf %72, %73 : vector<8x1xf32>
    %75 = vector.broadcast %67 : vector<8x1xf32> to vector<8x32xf32>
    %76 = arith.subf %63, %75 : vector<8x32xf32>
    %cst_33 = arith.constant 9.99999997E-7 : f32
    %77 = vector.broadcast %cst_33 : f32 to vector<8x1xf32>
    %78 = arith.addf %74, %77 : vector<8x1xf32>
    %79 = math.rsqrt %78 : vector<8x1xf32>
    %80 = vector.broadcast %79 : vector<8x1xf32> to vector<8x32xf32>
    %81 = arith.mulf %76, %80 : vector<8x32xf32>
    %cst_34 = arith.constant 1.000000e+00 : f32
    %82 = vector.broadcast %cst_34 : f32 to vector<1x32xf32>
    %83 = arith.addf %82, %19 : vector<1x32xf32>
    %84 = vector.broadcast %83 : vector<1x32xf32> to vector<8x32xf32>
    %85 = arith.mulf %81, %84 : vector<8x32xf32>
    %86 = vector.broadcast %18 : vector<1x32xf32> to vector<8x32xf32>
    %87 = arith.addf %85, %86 : vector<8x32xf32>
    %88 = arith.truncf %87 : vector<8x32xf32> to vector<8x32xbf16>
    %cst_35 = arith.constant 0.000000e+00 : f32
    %89 = vector.broadcast %cst_35 : f32 to vector<8x32xf32>
    %c0_i32_36 = arith.constant 0 : i32
    %c128_i32 = arith.constant 128 : i32
    %90 = arith.muli %c0_i32_36, %c128_i32 : i32
    %91 = tpu.assume_multiple %90, 128 : i32
    %c0_37 = arith.constant 0 : index
    %92 = arith.index_cast %91 : i32 to index
    %93 = vector.load %arg14[%c0_37, %92] : memref<32x128xbf16, #tpu.memory_space<vmem>>, vector<32x128xbf16>
    %cst_38 = arith.constant dense<0.000000e+00> : vector<8x128xf32>
    %94 = tpu.matmul %88, %93, %cst_38 {dimension_numbers = #tpu.dot_dimension_numbers<[1], [0], [0], [1], [0, 0, 1, 1], [], []>} : vector<8x32xbf16>, vector<32x128xbf16>, vector<8x128xf32> -> vector<8x128xf32>
    %c0_39 = arith.constant 0 : index
    %95 = arith.index_cast %91 : i32 to index
    %96 = vector.load %arg15[%c0_39, %95] : memref<1x128xf32, #tpu.memory_space<vmem>>, vector<1x128xf32>
    %97 = vector.broadcast %96 : vector<1x128xf32> to vector<8x128xf32>
    %98 = arith.addf %94, %97 : vector<8x128xf32>
    %99 = arith.mulf %98, %98 : vector<8x128xf32>
    %100 = arith.mulf %98, %99 : vector<8x128xf32>
    %cst_40 = arith.constant 4.471500e-02 : f32
    %101 = vector.broadcast %cst_40 : f32 to vector<8x128xf32>
    %102 = arith.mulf %101, %100 : vector<8x128xf32>
    %103 = arith.addf %98, %102 : vector<8x128xf32>
    %cst_41 = arith.constant 0.797884583 : f32
    %104 = vector.broadcast %cst_41 : f32 to vector<8x128xf32>
    %105 = arith.mulf %104, %103 : vector<8x128xf32>
    %106 = math.tanh %105 : vector<8x128xf32>
    %cst_42 = arith.constant 1.000000e+00 : f32
    %107 = vector.broadcast %cst_42 : f32 to vector<8x128xf32>
    %108 = arith.addf %107, %106 : vector<8x128xf32>
    %cst_43 = arith.constant 5.000000e-01 : f32
    %109 = vector.broadcast %cst_43 : f32 to vector<8x128xf32>
    %110 = arith.mulf %109, %108 : vector<8x128xf32>
    %111 = arith.mulf %98, %110 : vector<8x128xf32>
    %112 = arith.truncf %111 : vector<8x128xf32> to vector<8x128xbf16>
    %113 = arith.index_cast %91 : i32 to index
    %c0_44 = arith.constant 0 : index
    %114 = vector.load %arg16[%113, %c0_44] : memref<128x32xbf16, #tpu.memory_space<vmem>>, vector<128x32xbf16>
    %cst_45 = arith.constant dense<0.000000e+00> : vector<8x32xf32>
    %115 = tpu.matmul %112, %114, %cst_45 {dimension_numbers = #tpu.dot_dimension_numbers<[1], [0], [0], [1], [0, 0, 1, 1], [], []>} : vector<8x128xbf16>, vector<128x32xbf16>, vector<8x32xf32> -> vector<8x32xf32>
    %116 = arith.addf %89, %115 : vector<8x32xf32>
    %c1_i32_46 = arith.constant 1 : i32
    %c0_47 = arith.constant 0 : index
    %c0_48 = arith.constant 0 : index
    %117 = vector.load %arg17[%c0_47, %c0_48] : memref<1x32xf32, #tpu.memory_space<vmem>>, vector<1x32xf32>
    %118 = vector.broadcast %117 : vector<1x32xf32> to vector<8x32xf32>
    %119 = arith.addf %116, %118 : vector<8x32xf32>
    %120 = vector.broadcast %20 : vector<1x32xf32> to vector<8x32xf32>
    %121 = arith.mulf %120, %119 : vector<8x32xf32>
    %122 = arith.addf %63, %121 : vector<8x32xf32>
    %c0_49 = arith.constant 0 : index
    %c0_50 = arith.constant 0 : index
    %c0_51 = arith.constant 0 : index
    %123 = vector.load %arg18[%c0_49, %c0_50, %c0_51] : memref<1x8x32xf32, #tpu.memory_space<vmem>>, vector<1x8x32xf32>
    %124 = vector.shape_cast %123 : vector<1x8x32xf32> to vector<8x32xf32>
    %125 = vector.shape_cast %122 : vector<8x32xf32> to vector<1x8x32xf32>
    tpu.vector_store %arg18[%c0_49, %c0_50, %c0_51], %125 {strides = array<i32>} : memref<1x8x32xf32, #tpu.memory_space<vmem>>, vector<1x8x32xf32>,
    return
  }
  func.func @transform_0(%arg0: i32, %arg1: i32) -> (i32, i32, i32) {
    %c0_i32 = arith.constant 0 : i32
    %c0_i32_0 = arith.constant 0 : i32
    %c0_i32_1 = arith.constant 0 : i32
    return %arg0, %c0_i32, %c0_i32_0 : i32, i32, i32
  }
  func.func @transform_1(%arg0: i32, %arg1: i32) -> (i32, i32, i32) {
    %c0_i32 = arith.constant 0 : i32
    %c0_i32_0 = arith.constant 0 : i32
    %c0_i32_1 = arith.constant 0 : i32
    return %arg0, %c0_i32, %c0_i32_0 : i32, i32, i32
  }
  func.func @transform_2(%arg0: i32, %arg1: i32) -> (i32, i32) {
    %c0_i32 = arith.constant 0 : i32
    %c0_i32_0 = arith.constant 0 : i32
    %c0_i32_1 = arith.constant 0 : i32
    return %c0_i32, %c0_i32_0 : i32, i32
  }
  func.func @transform_3(%arg0: i32, %arg1: i32) -> (i32, i32) {
    %c0_i32 = arith.constant 0 : i32
    %c0_i32_0 = arith.constant 0 : i32
    %c0_i32_1 = arith.constant 0 : i32
    return %c0_i32, %c0_i32_0 : i32, i32
  }
  func.func @transform_4(%arg0: i32, %arg1: i32) -> (i32, i32) {
    %c0_i32 = arith.constant 0 : i32
    %c0_i32_0 = arith.constant 0 : i32
    %c0_i32_1 = arith.constant 0 : i32
    return %c0_i32, %c0_i32_0 : i32, i32
  }
  func.func @transform_5(%arg0: i32, %arg1: i32) -> (i32, i32) {
    %c0_i32 = arith.constant 0 : i32
    %c0_i32_0 = arith.constant 0 : i32
    %c0_i32_1 = arith.constant 0 : i32
    return %c0_i32, %c0_i32_0 : i32, i32
  }
  func.func @transform_6(%arg0: i32, %arg1: i32) -> (i32, i32) {
    %c0_i32 = arith.constant 0 : i32
    %c0_i32_0 = arith.constant 0 : i32
    %c0_i32_1 = arith.constant 0 : i32
    return %c0_i32, %c0_i32_0 : i32, i32
  }
  func.func @transform_7(%arg0: i32, %arg1: i32) -> (i32, i32) {
    %c0_i32 = arith.constant 0 : i32
    %c0_i32_0 = arith.constant 0 : i32
    %c0_i32_1 = arith.constant 0 : i32
    return %c0_i32, %c0_i32_0 : i32, i32
  }
  func.func @transform_8(%arg0: i32, %arg1: i32) -> (i32, i32) {
    %c0_i32 = arith.constant 0 : i32
    %c0_i32_0 = arith.constant 0 : i32
    %c0_i32_1 = arith.constant 0 : i32
    return %c0_i32, %c0_i32_0 : i32, i32
  }
  func.func @transform_9(%arg0: i32, %arg1: i32) -> (i32, i32) {
    %c0_i32 = arith.constant 0 : i32
    %c0_i32_0 = arith.constant 0 : i32
    %c0_i32_1 = arith.constant 0 : i32
    return %c0_i32, %c0_i32_0 : i32, i32
  }
  func.func @transform_10(%arg0: i32, %arg1: i32) -> (i32, i32) {
    %c0_i32 = arith.constant 0 : i32
    %c0_i32_0 = arith.constant 0 : i32
    %c0_i32_1 = arith.constant 0 : i32
    return %c0_i32, %c0_i32_0 : i32, i32
  }
  func.func @transform_11(%arg0: i32, %arg1: i32) -> (i32, i32) {
    %c0_i32 = arith.constant 0 : i32
    %c0_i32_0 = arith.constant 0 : i32
    %c0_i32_1 = arith.constant 0 : i32
    return %c0_i32, %c0_i32_0 : i32, i32
  }
  func.func @transform_12(%arg0: i32, %arg1: i32) -> (i32, i32) {
    %c0_i32 = arith.constant 0 : i32
    %c0_i32_0 = arith.constant 0 : i32
    %c0_i32_1 = arith.constant 0 : i32
    return %c0_i32, %c0_i32_0 : i32, i32
  }
  func.func @transform_13(%arg0: i32, %arg1: i32) -> (i32, i32) {
    %c0_i32 = arith.constant 0 : i32
    %c0_i32_0 = arith.constant 0 : i32
    %c0_i32_1 = arith.constant 0 : i32
    return %c0_i32, %c0_i32_0 : i32, i32
  }
  func.func @transform_14(%arg0: i32, %arg1: i32) -> (i32, i32) {
    %c0_i32 = arith.constant 0 : i32
    %c0_i32_0 = arith.constant 0 : i32
    %c0_i32_1 = arith.constant 0 : i32
    return %c0_i32, %c0_i32_0 : i32, i32
  }
  func.func @transform_15(%arg0: i32, %arg1: i32) -> (i32, i32) {
    %c0_i32 = arith.constant 0 : i32
    %c0_i32_0 = arith.constant 0 : i32
    %c0_i32_1 = arith.constant 0 : i32
    return %c0_i32, %c0_i32_0 : i32, i32
  }
  func.func @transform_16(%arg0: i32, %arg1: i32) -> (i32, i32, i32) {
    %c0_i32 = arith.constant 0 : i32
    %c0_i32_0 = arith.constant 0 : i32
    return %arg0, %arg1, %c0_i32 : i32, i32, i32
  }
}

</mosaic_0001>

<bundles_post_ra>
// kernel: tpu_custom_call.1
= control target key start
LH: loop header
LB: loop body
LE: loop exit
PB: predicated region body
PF: predicated region fallthrough
CT: control target
= control target key end

     0   :  { %s2624_s0 = inlined_call_operand.vmem [shape: f32[2,8,32], index: 0, kind: input, shape index: {}]   ;;  %s2625_s1 = inlined_call_operand.vmem [shape: f32[2,1,32], index: 1, kind: input, shape index: {}]   ;;  %s2626_s2 = inlined_call_operand.vmem [shape: bf16[32,192], index: 2, kind: input, shape index: {}]   ;;  %s2627_s3 = inlined_call_operand.vmem [shape: f32[1,192], index: 3, kind: input, shape index: {}]   ;;  %s2628_s4 = inlined_call_operand.vmem [shape: bf16[32,512], index: 4, kind: input, shape index: {}]   ;;  %s2629_s5 = inlined_call_operand.vmem [shape: bf16[32,512], index: 5, kind: input, shape index: {}]   ;;  %s2630_s6 = inlined_call_operand.vmem [shape: bf16[32,512], index: 6, kind: input, shape index: {}]   ;;  %s2631_s7 = inlined_call_operand.vmem [shape: f32[1,512], index: 7, kind: input, shape index: {}]   ;;  %s2632_s8 = inlined_call_operand.vmem [shape: f32[1,512], index: 8, kind: input, shape index: {}]   ;;  %s2633_s9 = inlined_call_operand.vmem [shape: f32[1,512], index: 9, kind: input, shape index: {}]   ;;  %s2634_s10 = inlined_call_operand.vmem [shape: bf16[512,32], index: 10, kind: input, shape index: {}]   ;;  %s2635_s11 = inlined_call_operand.vmem [shape: f32[1,32], index: 11, kind: input, shape index: {}]   ;;  %s2636_s12 = inlined_call_operand.vmem [shape: bf16[32,128], index: 12, kind: input, shape index: {}]   ;;  %s2637_s13 = inlined_call_operand.vmem [shape: f32[1,128], index: 13, kind: input, shape index: {}]   ;;  %s2638_s14 = inlined_call_operand.vmem [shape: bf16[128,32], index: 14, kind: input, shape index: {}]   ;;  %s2639_s15 = inlined_call_operand.vmem [shape: f32[1,32], index: 15, kind: input, shape index: {}]   ;;  %s2640_s16 = inlined_call_operand.hbm [shape: f32[2,8,32], index: 16, kind: output, shape index: {}]  }
   0x1   :  { %2652 = sst [smem:[#allocation15_spill]] %s2624_s0 }
   0x2   :  { %2653 = sst [smem:[#allocation16_spill]] %s2640_s16 }
   0x3   :  { %21 = vsyncpa [#allocation5], 0 }
   0x4   :  { %23 = vsyncpa [#allocation5 + $0x1], 0  ;;  %s2259_s21 = smov 0   ;;  %s2261_s22 = smov 0  }
   0x5   :  { %s2263_s23 = smov 0   ;;  %s2265_s24 = smov 0  }
   0x6   :  { %s2267_s25 = smov 0   ;;  %s2269_s26 = smov 0  }
   0x7 LB: > { %2654 = sst [smem:[#allocation7_spill]] %s2139_s21  ;;  %s1714_s27 = sadd.s32 4294967295, %s2159_s26   ;;  %s2159_s26 = sphi %s2269_s26, %s29_s26   ;;  %s2155_s25 = sphi %s2267_s25, %s2676_s25   ;;  %s2151_s24 = sphi %s2265_s24, %s2675_s24   ;;  %s2147_s23 = sphi %s2263_s23, %s2674_s23   ;;  %s2143_s22 = sphi %s2261_s22, %s2678_s22   ;;  %s2139_s21 = sphi %s2259_s21, %s2677_s21  }
   0x8   : > { %2655 = sst [smem:[#allocation8_spill]] %s2147_s23  ;;  %s1715_s28 = sadd.s32 4294967294, %s2159_s26  }
   0x9   : > { %2656 = sst [smem:[#allocation9_spill]] %s2155_s25  ;;  %s41_s29 = sadd.s32 1, %s2155_s25 }
   0xa   : > { %2657 = sst [smem:[#allocation10_spill]] %s2159_s26  ;;  %s396_s30 = sadd.s32 1, %s2147_s23 }
   0xb   : > { %p43_p0 = scmp.ge.s32.totalorder %s41_s29, 2  ;;  %p406_p1 = scmp.ne.s32.totalorder %s2147_s23, %s2143_s22 }
   0xc   : > { %p407_p2 = scmp.eq.s32.totalorder %s1714_s27, 1  ;;  %p412_p3 = scmp.ne.s32.totalorder %s2143_s22, %s2139_s21 }
   0xd   : > { %s2680_s29 = smov (%p43_p0, %s41_s29), 0  ;;  %p413_p5 = scmp.eq.s32.totalorder %s1715_s28, 1 }
   0xe   : > { %2658 = sst [smem:[#allocation11_spill]] %s2680_s29  ;;  %p2299_p4 = por %p407_p2, %p406_p1 }
   0xf   : > { %s391_s17 = ssub.s32 %s2155_s25, %s2680_s29  ;;  %p1718_p6 = scmp.ge.s32.totalorder %s2159_s26, 1 }
  0x10   : > { %s2659_s0 = scalar_select %p2299_p4, 1, 0 }
  0x11   : > { %p394_p7 = scmp.eq.s32.totalorder %s391_s17, 0  ;;  %p2306_p8 = por %p413_p5, %p412_p3 }
  0x12   : > { %2660 = sst [smem:[#allocation12_spill]] %s2659_s0  ;;  %p486_p9 = scmp.lt.s32.totalorder %s2159_s26, 3 }
  0x13   : > { %s2661_s18 = scalar_select %p2306_p8, 1, 0 }
  0x14   : > { %s2312_s19 = scalar_select %p394_p7, %s2147_s23, %s396_s30  }
  0x15   : > { %2662 = sst [smem:[#allocation13_spill]] %s2661_s18  ;;  %p487_p10 = pnand %p1718_p6, %p486_p9 }
  0x16   : > { %2663 = sst [smem:[#allocation14_spill]] %s2312_s19  ;;  %p538_p11 = scmp.lt.s32.totalorder (!%p487_p10), %s2151_s24, 1  ;;  %v2003_v0 = vld [vmem:[%s2626_s2 + $0x4] ss:$8 sps:$4 sm:$0xff] (!%p487_p10)   ;;  %v2005_v1 = vld [vmem:[%s2626_s2] ss:$8 sps:$4 sm:$0xff] (!%p487_p10)   ;;  %v582_v19 = vlaneseq (!%p487_p10) }
  0x17   : > { %490 = sbr.rel (%p487_p10) target bundleno = 2724 (0xaa4), region = 84  ;;  %s2646_s20 = sand.u32 (!%p487_p10), 1, %s2143_s22   ;;  %v2006_v2 = vld [vmem:[%s2626_s2 + $0x14] ss:$8 sps:$4 sm:$0xff] (!%p487_p10)   ;;  %596 = vmatprep.subr.bf16.mxu0 (!%p487_p10), %v2003_v0  ;;  %v2165_v3 = vmov (!%p487_p10), 0   ;;  %vm592_vm0 = vcmask (!%p487_p10), 261120  }
  0x18   : > { %s2318_s27 = sshll.u32 (!%p487_p10), %s2646_s20, 3  ;;  %628 = vmatprep.mubr.bf16.mxu0 (!%p487_p10), %v2165_v3  ;;  %597 = vmatpush1.bf16.msra.mxu0 (!%p487_p10), %v2005_v1  ;;  %v2008_v4 = vld [vmem:[%s2626_s2 + $0x10] ss:$8 sps:$4 sm:$0xff] (!%p487_p10)   ;;  %s2664_s16 = sld [smem:[#allocation15_spill]] (!%p487_p10)  ;;  %v583_v20 = vshrl.u32 (!%p487_p10), %v582_v19, 7  ;;  %vm668_vm1 = vcmask (!%p487_p10), 257024  }
  0x19   : > { %598 = vmatprep.subr.bf16.mxu0 (!%p487_p10), %v2006_v2  ;;  %v560_v22 = vld [vmem:[%s2627_s3] sm:$0x3] (!%p487_p10)  ;;  %s2166_s23 = smov (!%p487_p10), 96  }
  0x1a   : > { %v2345_v21 = vsub.s32 (!%p487_p10), 0, %v583_v20  ;;  %v588_v23 = vsub.s32 (!%p487_p10), 1, %v583_v20 }
  0x1c   : > { %599 = vmatpush1.bf16.msra.mxu0 (!%p487_p10), %v2008_v4  ;;  %v585_v24 = vrot.slane (!%p487_p10), %v560_v22, %v2345_v21  ;;  %v589_v25 = vrot.slane (!%p487_p10), %v560_v22, %v588_v23 }
  0x1e   : > { %s539_s30 = scalar_select %p538_p11, %s2151_s24, 1 }
  0x20   : > { %s1720_s18 = sshll.u32 %s539_s30, 3  ;;  %s544_s26 = scalar_lea.vmem %s2625_s1, %s539_s30 }
  0x21   : > { %s2339_s0 = scalar_lea.vmem %s2664_s16, %s1720_s18  ;;  %v547_v5 = vld [vmem:[%s544_s26] sm:$0x1]  ;;  %s2362_s18 = smov 0  }
  0x22   : > { %v1721_v6 = vmul.f32 -1.442695, %v547_v5  ;;  %v637_v7 = vld [vmem:[%s2339_s0] sm:$0xff] }
  0x23   : > { %v638_v8 = vsel %vm592_vm0, %v637_v7, 0.0 }
  0x24   : > { %2009 = vpow2.f32 %v1721_v6  ;;  %639 = vadd.xlane.f32.xlu0 %v638_v8 }
  0x2e   : > { %v2010_v9 = vpop.eup %2009 }
  0x2f   : > { %v551_v10 = vadd.f32 1.0, %v2010_v9 }
  0x31   : > { %2011 = vrcp.f32 %v551_v10 }
  0x3b   : > { %v2012_v11 = vpop.eup %2011 }
  0x3c   : > { %v554_v12 = vmul.f32 %v2012_v11, %v547_v5 }
  0x3e   : > { %v555_v13 = vpack.c.bf16 %v554_v12, %v554_v12 }
  0x40   : > { %1726 = vmatmul.mubr.msk.bf16.vlgmr.msra.gmra.mrb[0].mxu0 %vm592_vm0, %v555_v13 }
  0xb1   : > { %v640_v14 = vpop.xlane.xlu0 %639 }
  0xb2   : > { %v642_v15 = vmul.f32 0.03125, %v640_v14 }
  0xb4   : > { %v643_v16 = vsub.f32 %v637_v7, %v642_v15 }
  0xb6   : > { %v644_v17 = vmul.f32 %v643_v16, %v643_v16 }
  0xb8   : > { %v645_v18 = vsel %vm592_vm0, %v644_v17, 0.0 }
  0xb9   : > { %646 = vadd.xlane.f32.xlu0 %v645_v18 }
 0x113   : > { %v630_v26 = vpop.f32.mrb[0].mxu0 }
 0x114   : > { %v631_v27 = vadd.f32 %v630_v26, %v585_v24  ;;  %v632_v28 = vpop.f32.mrb[1].mxu0 }
 0x115   : > { %v2351_v29 = vadd.f32 %v632_v28, %v589_v25  ;;  %v634_v30 = vpop.f32.mrb[2].mxu0 }
 0x116   : > { %v652_v31 = vadd.f32 1.0, %v631_v27  ;;  %v635_v32 = vpop.f32.mrb[3].mxu0  ;;  %v2356_v40 = vrot.slane %v631_v27, %v2345_v21 }
 0x118   : > { %v656_v33 = vrot.slane %v652_v31, %v2345_v21 }
 0x11a   : > { %658 = vrot.lane.b32.xlu1 %v656_v33, %s2166_s23 }
 0x146   : > { %v647_v34 = vpop.xlane.xlu0 %646 }
 0x147   : > { %v648_v35 = vmul.f32 0.03125, %v647_v34 }
 0x149   : > { %v649_v36 = vadd.f32 1e-06, %v648_v35 }
 0x14b   : > { %2013 = vrsqrt.f32 %v649_v36 }
 0x155   : > { %v2014_v37 = vpop.eup %2013 }
 0x156   : > { %v651_v38 = vmul.f32 %v2014_v37, %v643_v16 }
 0x18c   : > { %v659_v39 = vpop.permute.xlu1 %658 }
 0x18d   : > { %v661_v41 = vmul.f32 %v659_v39, %v651_v38 }
 0x18f   : > { %v666_v42 = vadd.f32 %v2356_v40, %v661_v41 }
 0x191   : > { %v667_v43 = vpack.c.bf16 %v666_v42, %v666_v42 }
 0x193   : > { %669 = vst.msk [vmem:[#allocation2] sm:$0xf] %vm668_vm1, %v667_v43 }
 0x19a   : > { %v2359_v44 = vld [vmem:[#allocation2] sm:$0xf] }
 0x19b LB: >> { %v2167_v45 = vmov 0.0   ;;  %s1727_s19 = sshll.u32 %s2163_s18, 7  ;;  %vm2168_vm2 = vmmov 0   ;;  %v754_v50 = vld [vmem:[#allocation2] sm:$0xf]  ;;  %vm933_vm3 = vcmask 64512   ;;  %s2163_s18 = sphi %s2362_s18, %s680_s18  }
 0x19c   : >> { %1876 = vmatprep.subr.bf16.mxu1 %v2167_v45  ;;  %1868 = vmatprep.subr.bf16.mxu0 %v2167_v45  ;;  %s2370_s20 = sshra.s32 %s1727_s19, 7  ;;  %vm953_vm4 = vcmask 1043456   ;;  %s680_s18 = sadd.s32 1, %s2163_s18  }
 0x19d   : >> { %1880 = vmatprep.mubr.msk.bf16.mxu1 %vm2168_vm2, %v2167_v45  ;;  %1872 = vmatprep.mubr.msk.bf16.mxu0 %vm2168_vm2, %v2167_v45  ;;  %s2373_s30 = sshll.u32 %s2370_s20, 2  ;;  %s761_s16 = scalar_lea.vmem %s2632_s8, %s2370_s20 }
 0x19e   : >> { %s756_s25 = scalar_lea.vmem %s2629_s5, %s2373_s30  ;;  %s685_s21 = scalar_lea.vmem %s2628_s4, %s2373_s30  ;;  %v1734_v53 = vld [vmem:[%s761_s16] ss:$0 sm:$0xff] }
 0x19f   : >> { %v2015_v46 = vld [vmem:[%s756_s25] ss:$16 sps:$4 sm:$0xff]   ;;  %s826_s17 = scalar_lea.vmem %s2630_s6, %s2373_s30  ;;  %s690_s19 = scalar_lea.vmem %s2631_s7, %s2370_s20 }
 0x1a0   : >> { %v2016_v47 = vld [vmem:[%s756_s25 + $0x20] ss:$16 sps:$4 sm:$0xff]   ;;  %1877 = vmatpush3.bf16.msra.mxu1 %v2015_v46  ;;  %p677_p12 = scmp.ge.s32.totalorder %s680_s18, 4  }
 0x1a1   : >> { %v2017_v48 = vld [vmem:[%s685_s21] ss:$16 sps:$4 sm:$0xff]   ;;  %1878 = vmatprep.subr.bf16.mxu1 %v2167_v45  ;;  %v2032_v46 = vld [vmem:[%s2634_s10 + $0xc8] sm:$0xff] (%p677_p12)   ;;  %s2169_s25 = smov (%p677_p12), 64   ;;  %s2170_s29 = smov (%p677_p12), 32   ;;  %vm2172_vm5 = vmmov (%p677_p12), 0  }
 0x1a2   : >> { %1869 = vmatpush3.bf16.msra.mxu0 %v2017_v48  ;;  %v2018_v49 = vld [vmem:[%s685_s21 + $0x20] ss:$16 sps:$4 sm:$0xff]   ;;  %v2034_v48 = vld [vmem:[%s2634_s10 + $0x88] sm:$0xff] (%p677_p12)   ;;  %s2666_s26 = scalar_lea.vmem (%p677_p12), [#allocation4], %s2318_s27 }
 0x1a3   : >> { %1870 = vmatprep.subr.bf16.mxu0 %v2167_v45  ;;  %v2019_v51 = vld [vmem:[%s826_s17] ss:$16 sps:$4 sm:$0xff]  }
 0x1a4   : >> { %1879 = vmatpush3.bf16.msra.mxu1 %v2016_v47  ;;  %v2020_v52 = vld [vmem:[%s826_s17 + $0x20] ss:$16 sps:$4 sm:$0xff]   ;;  %s831_s17 = scalar_lea.vmem %s2633_s9, %s2370_s20  ;;  %s1002_s20 = scalar_lea.vmem [#allocation3], %s2373_s30  ;;  %v2033_v47 = vld [vmem:[%s2634_s10 + $0x8] sm:$0xff] (%p677_p12)  }
 0x1a5   : >> { %1892 = vmatprep.subr.bf16.mxu1 %v2167_v45  ;;  %v1729_v57 = vld [vmem:[%s690_s19] ss:$0 sm:$0xff]  ;;  %s1796_s19 = sshll.u32 (%p677_p12), %s2151_s24, 7  ;;  %s1617_s30 = sshll.u32 (%p677_p12), %s2666_s26, 4  ;;  %s2574_s30 = int_to_ptr.vmem [resolvable:$true] %s1617_s30 }
 0x1a6   : >> { %1871 = vmatpush3.bf16.msra.mxu0 %v2018_v49  ;;  %v1739_v10 = vld [vmem:[%s831_s17] ss:$0 sm:$0xff]  ;;  %v2035_v49 = vld [vmem:[%s2634_s10 + $0x50] sm:$0xff] (%p677_p12)   ;;  %s2667_s17 = sld [smem:[#allocation16_spill]] (%p677_p12) }
 0x1a7   : >> { %1881 = vmatmul.mubr.msk.bf16.vlgmr.msra.gmra.mrb[0].mxu1 %vm592_vm0, %v754_v50  ;;  %1884 = vmatprep.subr.bf16.mxu0 %v2167_v45  ;;  %v2027_v41 = vld [vmem:[%s2634_s10 + $0x40] sm:$0xff] (%p677_p12)  }
 0x1a8   : >> { %1894 = vmatprep.mubr.msk.bf16.mxu1 %vm2168_vm2, %v2167_v45  ;;  %v2028_v42 = vld [vmem:[%s2634_s10 + $0xc0] sm:$0xff] (%p677_p12)  }
 0x1a9   : >> { %1873 = vmatmul.mubr.msk.bf16.vlgmr.msra.gmra.mrb[0].mxu0 %vm592_vm0, %v2359_v44  ;;  %v2029_v43 = vld [vmem:[%s2634_s10] sm:$0xff] (%p677_p12)   ;;  %v2031_v44 = vld [vmem:[%s2634_s10 + $0x48] sm:$0xff] (%p677_p12)  }
 0x1aa   : >> { %1888 = vmatprep.mubr.msk.bf16.mxu0 %vm2168_vm2, %v2167_v45  ;;  %1885 = vmatpush3.bf16.msra.mxu0 %v2019_v51  ;;  %v2037_v51 = vld [vmem:[%s2634_s10 + $0x10] sm:$0xff] (%p677_p12)  }
 0x1ab   : >> { %1886 = vmatprep.subr.bf16.mxu0 %v2167_v45 }
 0x1ae   : >> { %1887 = vmatpush3.bf16.msra.mxu0 %v2020_v52  ;;  %v2038_v52 = vld [vmem:[%s2634_s10 + $0x90] sm:$0xff] (%p677_p12)  }
 0x1af   : >> { %1898 = vmatprep.subr.bf16.mxu0 %v2167_v45 }
 0x1b1   : >> { %1889 = vmatmul.mubr.msk.bf16.vlgmr.msra.gmra.mrb[4].mxu0 %vm592_vm0, %v754_v50  ;;  %v2036_v50 = vld [vmem:[%s2634_s10 + $0xd0] sm:$0xff] (%p677_p12)  }
 0x1b2   : >> { %1900 = vmatprep.mubr.msk.bf16.mxu0 %vm2168_vm2, %v2167_v45  ;;  %v2030_v45 = vld [vmem:[%s2634_s10 + $0x80] sm:$0xff] (%p677_p12)  }
 0x27a   : >> { %v818_v54 = vpop.f32.mrb[0].mxu1 }
 0x27b   : >> { %v819_v55 = vadd.f32 %v1734_v53, %v818_v54  ;;  %v1882_v56 = vpop.f32.mrb[1].mxu1  ;;  %v2039_v53 = vld [vmem:[%s2634_s10 + $0x58] sm:$0xff] (%p677_p12)  }
 0x27c   : >> { %v821_v58 = vpop.f32.mrb[2].mxu1  ;;  %v747_v59 = vpop.f32.mrb[0].mxu0  ;;  %v2040_v54 = vld [vmem:[%s2634_s10 + $0xd8] sm:$0xff] (%p677_p12)  }
 0x27d   : >> { %v824_v60 = vpack.c.bf16 %v819_v55, %v819_v55  ;;  %v1883_v61 = vpop.f32.mrb[3].mxu1  ;;  %v1874_v62 = vpop.f32.mrb[1].mxu0  ;;  %v748_v63 = vadd.f32 %v1729_v57, %v747_v59  ;;  %v2041_v55 = vld [vmem:[%s2634_s10 + $0x18] sm:$0xff] (%p677_p12)   ;;  %v2043_v57 = vld [vmem:[%s2634_s10 + $0x60] sm:$0xff] (%p677_p12)  }
 0x27e   : >> { %v750_v0 = vpop.f32.mrb[2].mxu0  ;;  %v2042_v56 = vld [vmem:[%s2634_s10 + $0x98] sm:$0xff] (%p677_p12)   ;;  %v2044_v58 = vld [vmem:[%s2634_s10 + $0xe0] sm:$0xff] (%p677_p12)   ;;  %v2047_v61 = vld [vmem:[%s2634_s10 + $0x68] sm:$0xff] (%p677_p12)  }
 0x27f   : >> { %1893 = vmatpush3.bf16.xpose.msra.mxu1 %v824_v60  ;;  %v1875_v1 = vpop.f32.mrb[3].mxu0  ;;  %v753_v2 = vpack.c.bf16 %v748_v63, %v748_v63  ;;  %v2045_v59 = vld [vmem:[%s2634_s10 + $0x20] sm:$0xff] (%p677_p12)   ;;  %v2048_v62 = vld [vmem:[%s2634_s10 + $0xe8] sm:$0xff] (%p677_p12)  }
 0x280   : > { %1834 = vmatprep.subr.bf16.mxu1 (%p677_p12), %v2028_v42  ;;  %v2046_v60 = vld [vmem:[%s2634_s10 + $0xa0] sm:$0xff] (%p677_p12)   ;;  %v2049_v63 = vld [vmem:[%s2634_s10 + $0x28] sm:$0xff] (%p677_p12)   ;;  %v2051_v1 = vld [vmem:[%s2634_s10 + $0x70] sm:$0xff] (%p677_p12)  }
 0x281   : > { %v2050_v0 = vld [vmem:[%s2634_s10 + $0xa8] sm:$0xff] (%p677_p12)   ;;  %v2063_v42 = vld [vmem:[%s2636_s12] sm:$0xff] (%p677_p12)  }
 0x284   : >> { %v885_v9 = vpop.f32.mrb[4].mxu0 }
 0x285   : >> { %v1890_v11 = vpop.f32.mrb[5].mxu0  ;;  %v886_v12 = vadd.f32 %v1739_v10, %v885_v9 }
 0x286   : >> { %1895 = vmatmul.mubr.bf16.vlgmr.msra.gmra.mrb[4].mxu1 %v753_v2  ;;  %v888_v13 = vpop.f32.mrb[6].mxu0  ;;  %v2052_v2 = vld [vmem:[%s2634_s10 + $0xf0] sm:$0xff] (%p677_p12)  }
 0x287   : >> { %v1891_v14 = vpop.f32.mrb[7].mxu0  ;;  %v891_v15 = vpack.c.bf16 %v886_v12, %v886_v12  ;;  %1835 = vmatpush3.bf16.msra.mxu1 (%p677_p12), %v2030_v45 }
 0x288   : > { %1836 = vmatprep.subr.bf16.mxu1 (%p677_p12), %v2032_v46 }
 0x289   : >> { %v955_v16 = vsel %vm953_vm4, %v891_v15, 0 }
 0x28a   : >> { %1899 = vmatpush3.bf16.msra.mxu0 %v955_v16 }
 0x28b   : > { %1812 = vmatprep.subr.bf16.mxu0 (%p677_p12), %v2027_v41  ;;  %1837 = vmatpush3.bf16.msra.mxu1 (%p677_p12), %v2034_v48 }
 0x28c   : > { %1838 = vmatprep.subr.bf16.mxu1 (%p677_p12), %v2036_v50 }
 0x28f   : > { %1839 = vmatpush3.bf16.msra.mxu1 (%p677_p12), %v2038_v52 }
 0x290   : > { %1840 = vmatprep.subr.bf16.mxu1 (%p677_p12), %v2040_v54 }
 0x293   : > { %1841 = vmatpush3.bf16.msra.mxu1 (%p677_p12), %v2042_v56  ;;  %v2066_v56 = vld [vmem:[%s2638_s14 + $0x8] sm:$0xff] (%p677_p12)  }
 0x294   : > { %1842 = vmatprep.subr.bf16.mxu1 (%p677_p12), %v2044_v58  ;;  %v2068_v58 = vld [vmem:[%s2638_s14 + $0x18] sm:$0xff] (%p677_p12)  }
 0x297   : > { %1843 = vmatpush3.bf16.msra.mxu1 (%p677_p12), %v2046_v60  ;;  %v2070_v60 = vld [vmem:[%s2638_s14 + $0x28] sm:$0xff] (%p677_p12)  }
 0x298   : > { %1844 = vmatprep.subr.bf16.mxu1 (%p677_p12), %v2048_v62  ;;  %v2072_v62 = vld [vmem:[%s2638_s14 + $0x38] sm:$0xff] (%p677_p12)  }
 0x29b   : > { %1845 = vmatpush3.bf16.msra.mxu1 (%p677_p12), %v2050_v0 }
 0x29c   : > { %1846 = vmatprep.subr.bf16.mxu1 (%p677_p12), %v2052_v2 }
 0x359   : >> { %v926_v3 = vpop.f32.mrb[4].mxu1 }
 0x35a   : >> { %v932_v4 = vmul.f32 0.35355338, %v926_v3  ;;  %v1896_v5 = vpop.f32.mrb[5].mxu1  ;;  %v2053_v3 = vld [vmem:[%s2634_s10 + $0x30] sm:$0xff] (%p677_p12)  }
 0x35b   : >> { %v929_v6 = vpop.f32.mrb[6].mxu1  ;;  %v2055_v5 = vld [vmem:[%s2634_s10 + $0x78] sm:$0xff] (%p677_p12)  }
 0x35c   : >> { %v1897_v7 = vpop.f32.mrb[7].mxu1  ;;  %v934_v8 = vsel %vm933_vm3, %v932_v4, -inf  ;;  %v2056_v6 = vld [vmem:[%s2634_s10 + $0xf8] sm:$0xff] (%p677_p12)  }
 0x35d   : >> { %935 = vmax.xlane.f32.xlu0 %v934_v8  ;;  %v2057_v7 = vld [vmem:[%s2634_s10 + $0x38] sm:$0xff] (%p677_p12)  }
 0x35e   : > { %v2058_v8 = vld [vmem:[%s2634_s10 + $0xb8] sm:$0xff] (%p677_p12)  }
 0x3ea   : >> { %v936_v17 = vpop.xlane.xlu0 %935 }
 0x3eb   : >> { %v937_v18 = vmax.f32 %v936_v17, -1e+30  ;;  %v1745_v17 = vld [vmem:[%s2635_s11] ss:$0 sm:$0xff] (%p677_p12) }
 0x3ed   : >> { %v941_v19 = vsub.f32 %v932_v4, %v937_v18  ;;  %v938_v25 = vsub.f32 -1e+30, %v937_v18  ;;  %v2054_v4 = vld [vmem:[%s2634_s10 + $0xb0] sm:$0xff] (%p677_p12)  }
 0x3ee   : > { %1847 = vmatpush3.bf16.msra.mxu1 (%p677_p12), %v2054_v4 }
 0x3ef   : >> { %v942_v20 = vmul.f32 1.442695, %v941_v19  ;;  %v939_v26 = vmul.f32 1.442695, %v938_v25  ;;  %1848 = vmatprep.subr.bf16.mxu1 (%p677_p12), %v2056_v6 }
 0x3f1   : >> { %2021 = vpow2.f32 %v942_v20 }
 0x3f2   : >> { %2023 = vpow2.f32 %v939_v26  ;;  %1849 = vmatpush3.bf16.msra.mxu1 (%p677_p12), %v2058_v8 }
 0x3fb   : >> { %v2022_v22 = vpop.eup %2021 }
 0x3fc   : >> { %v945_v23 = vsel %vm933_vm3, %v2022_v22, 0.0  ;;  %v949_v24 = vpack.c.bf16 %v2022_v22, %v2022_v22  ;;  %v2024_v27 = vpop.eup %2023 }
 0x3fd   : >> { %946 = vadd.xlane.f32.xlu0 %v945_v23  ;;  %v944_v30 = vmul.f32 0.0, %v2024_v27 }
 0x3fe   : >> { %1901 = vmatmul.mubr.msk.bf16.vlgmr.msra.gmra.mrb[8].mxu0 %vm933_vm3, %v949_v24 }
 0x3ff   : > { %1813 = vmatpush3.bf16.msra.mxu0 (%p677_p12), %v2029_v43  ;;  %v2171_v43 = vmov (%p677_p12), 0.0  }
 0x400   : > { %1814 = vmatprep.subr.bf16.mxu0 (%p677_p12), %v2031_v44  ;;  %1912 = vmatprep.subr.bf16.mxu1 (%p677_p12), %v2171_v43 }
 0x403   : > { %1815 = vmatpush3.bf16.msra.mxu0 (%p677_p12), %v2033_v47  ;;  %v1388_v47 = vadd.f32 (%p677_p12), 1.0, %v2351_v29 }
 0x404   : > { %1816 = vmatprep.subr.bf16.mxu0 (%p677_p12), %v2035_v49 }
 0x405   : > { %v1392_v48 = vrot.slane (%p677_p12), %v1388_v47, %v2345_v21 }
 0x407   : > { %1817 = vmatpush3.bf16.msra.mxu0 (%p677_p12), %v2037_v51 }
 0x408   : > { %1818 = vmatprep.subr.bf16.mxu0 (%p677_p12), %v2039_v53 }
 0x40b   : > { %1819 = vmatpush3.bf16.msra.mxu0 (%p677_p12), %v2041_v55  ;;  %v2065_v55 = vld [vmem:[%s2638_s14] sm:$0xff] (%p677_p12)  }
 0x40c   : > { %1820 = vmatprep.subr.bf16.mxu0 (%p677_p12), %v2043_v57  ;;  %v2067_v57 = vld [vmem:[%s2638_s14 + $0x10] sm:$0xff] (%p677_p12)  }
 0x40f   : > { %1821 = vmatpush3.bf16.msra.mxu0 (%p677_p12), %v2045_v59  ;;  %v2069_v59 = vld [vmem:[%s2638_s14 + $0x20] sm:$0xff] (%p677_p12)  }
 0x410   : > { %1822 = vmatprep.subr.bf16.mxu0 (%p677_p12), %v2047_v61  ;;  %v2071_v61 = vld [vmem:[%s2638_s14 + $0x30] sm:$0xff] (%p677_p12)  }
 0x413   : > { %1823 = vmatpush3.bf16.msra.mxu0 (%p677_p12), %v2049_v63  ;;  %v1782_v63 = vld [vmem:[%s2637_s13] ss:$0 sm:$0xff] (%p677_p12) }
 0x414   : > { %1824 = vmatprep.subr.bf16.mxu0 (%p677_p12), %v2051_v1 }
 0x417   : > { %1825 = vmatpush3.bf16.msra.mxu0 (%p677_p12), %v2053_v3 }
 0x418   : > { %1826 = vmatprep.subr.bf16.mxu0 (%p677_p12), %v2055_v5 }
 0x41b   : > { %1827 = vmatpush3.bf16.msra.mxu0 (%p677_p12), %v2057_v7 }
 0x41c   : > { %1904 = vmatprep.subr.bf16.mxu0 (%p677_p12), %v2171_v43 }
 0x48a   : >> { %v947_v28 = vpop.xlane.xlu0 %946 }
 0x48b   : >> { %v948_v31 = vadd.f32 %v947_v28, %v944_v30 }
 0x48d   : >> { %2025 = vrcp.f32 %v948_v31 }
 0x497   : >> { %v2026_v35 = vpop.eup %2025 }
 0x4d1   : >> { %v991_v32 = vpop.f32.mrb[8].mxu0 }
 0x4d2   : >> { %v997_v33 = vadd.f32 %v991_v32, %v944_v30  ;;  %v1902_v34 = vpop.f32.mrb[9].mxu0  ;;  %679 = sbr.rel (!%p677_p12) target bundleno = 411 (0x19b), region = 138  ;;  %v1364_v32 = vld [vmem:[%s2339_s0] sm:$0xff] (%p677_p12)  ;;  %s2173_s0 = smov (%p677_p12), [#allocation4]  }
 0x4d3   : >> { %v994_v36 = vpop.f32.mrb[10].mxu0  ;;  %s2081_s16 = sshll.u32 (%p677_p12), %s2173_s0, 4  ;;  %s2082_s16 = int_to_ptr.vmem [resolvable:$false] %s2081_s16 }
 0x4d4   : >> { %v999_v37 = vmul.f32 %v2026_v35, %v997_v33  ;;  %v1903_v38 = vpop.f32.mrb[11].mxu0  ;;  %p2084_p2 = scmp.lt.s32.totalorder (%p677_p12), %s2574_s30, %s2082_s16 }
 0x4d6   : >> { %v1000_v39 = vpack.c.bf16 %v999_v37, %v999_v37 }
 0x4d8   : >> { %1003 = vst [vmem:[%s1002_s20] sm:$0xf] %v1000_v39  ;;  %s2572_s20 = scalar_lea.hbm (%p677_p12), %s2667_s17, %s1796_s19  ;;  %s2083_s19 = scalar_lea.vmem (%p677_p12), %s2082_s16, 256 }
 0x4df   : > { %v1004_v9 = vld [vmem:[#allocation3] sm:$0xff]  ;;  %v1005_v10 = vld [vmem:[#allocation3 + $0x8] sm:$0xff] }
 0x4e0   : > { %v1746_v11 = vcombine.low %v1004_v9, %v1004_v9  ;;  %v1747_v12 = vcombine.high %v1004_v9, %v1004_v9  ;;  %v1748_v13 = vcombine.low %v1005_v10, %v1005_v10  ;;  %v1749_v14 = vcombine.high %v1005_v10, %v1005_v10 }
 0x4e2   : > { %1315 = vmatprep.mubr.bf16.mxu0 %v1747_v12  ;;  %1355 = vmatprep.mubr.bf16.mxu1 %v1749_v14 }
 0x4e3   : > { %1316 = vmatmul.mubr.bf16.vlgmr.msra.gmra.mrb[0].mxu0 %v1746_v11  ;;  %1356 = vmatmul.mubr.bf16.vlgmr.msra.gmra.mrb[0].mxu1 %v1748_v13 }
 0x4e4   : > { %1905 = vmatpush3.bf16.msra.mxu0 %v2063_v42  ;;  %1908 = vmatprep.mubr.msk.bf16.mxu0 %vm2172_vm5, %v2171_v43 }
 0x4e5   : > { %1906 = vmatprep.subr.bf16.mxu0 %v2171_v43  ;;  %1928 = vmatprep.mubr.msk.bf16.mxu1 %vm2172_vm5, %v2171_v43 }
 0x4e6   : > { %1913 = vmatpush3.bf16.msra.mxu1 %v2065_v55 }
 0x4e7   : > { %1914 = vmatprep.subr.bf16.mxu1 %v2171_v43 }
 0x4ea   : > { %1915 = vmatpush3.bf16.msra.mxu1 %v2066_v56 }
 0x4eb   : > { %1916 = vmatprep.subr.bf16.mxu1 %v2171_v43 }
 0x4ee   : > { %1917 = vmatpush3.bf16.msra.mxu1 %v2067_v57 }
 0x4ef   : > { %1918 = vmatprep.subr.bf16.mxu1 %v2171_v43 }
 0x4f2   : > { %1919 = vmatpush3.bf16.msra.mxu1 %v2068_v58 }
 0x4f3   : > { %1920 = vmatprep.subr.bf16.mxu1 %v2171_v43 }
 0x4f6   : > { %1921 = vmatpush3.bf16.msra.mxu1 %v2069_v59 }
 0x4f7   : > { %1922 = vmatprep.subr.bf16.mxu1 %v2171_v43 }
 0x4fa   : > { %1923 = vmatpush3.bf16.msra.mxu1 %v2070_v60 }
 0x4fb   : > { %1924 = vmatprep.subr.bf16.mxu1 %v2171_v43 }
 0x4fe   : > { %1925 = vmatpush3.bf16.msra.mxu1 %v2071_v61 }
 0x4ff   : > { %1926 = vmatprep.subr.bf16.mxu1 %v2171_v43 }
 0x502   : > { %1927 = vmatpush3.bf16.msra.mxu1 %v2072_v62 }
 0x5b6   : > { %v1828_v15 = vpop.f32.mrb[0].mxu0  ;;  %v1850_v16 = vpop.f32.mrb[0].mxu1 }
 0x5b7   : > { %v1829_v18 = vpop.f32.mrb[1].mxu0  ;;  %v1851_v19 = vpop.f32.mrb[1].mxu1 }
 0x5b8   : > { %v1830_v20 = vadd.f32 %v1829_v18, %v1828_v15  ;;  %v1852_v22 = vadd.f32 %v1851_v19, %v1850_v16  ;;  %v1831_v23 = vpop.f32.mrb[2].mxu0  ;;  %v1853_v24 = vpop.f32.mrb[2].mxu1  ;;  %v1786_v15 = vld [vmem:[%s2639_s15] ss:$0 sm:$0xff] }
 0x5b9   : > { %v1832_v25 = vpop.f32.mrb[3].mxu0  ;;  %v1854_v26 = vpop.f32.mrb[3].mxu1 }
 0x5ba   : > { %v1318_v27 = vadd.f32 %v1830_v20, %v1745_v17 }
 0x5bc   : > { %v1358_v28 = vadd.f32 %v1852_v22, %v1318_v27  ;;  %v1590_v22 = vrot.slane %v2351_v29, %v2345_v21 }
 0x5be   : > { %1366 = vrot.lane.b32.xlu0 %v1358_v28, %s2169_s25 }
 0x630   : > { %v1367_v30 = vpop.permute.xlu0 %1366 }
 0x631   : > { %v1369_v31 = vmul.f32 %v1367_v30, %v2356_v40 }
 0x633   : > { %1371 = vrot.lane.b32.xlu0 %v1369_v31, %s2169_s25  ;;  %s2077_s25 = scalar_lea.vmem %s2574_s30, 128 }
 0x634   : > { %p2078_p13 = scmp.ne.s32.totalorder %s2574_s30, %s2077_s25  ;;  %p2085_p3 = scmp.lt.s32.totalorder %s2083_s19, %s2077_s25 }
 0x636   : > { %p2079_p0 = pnand %p2078_p13, %p2299_p4  ;;  %p2086_p5 = por %p2085_p3, %p2084_p2 }
 0x637   : > { %1395 = vrot.lane.b32.xlu0 %v2356_v40, %s2170_s29  ;;  %v2064_v40 = vld [vmem:[%s2636_s12 + $0x8] sm:$0xff]  }
 0x638   : > { %1907 = vmatpush3.bf16.msra.mxu0 %v2064_v40  ;;  %p2080_p1 = pneg %p2079_p0 }
 0x63a   : > { %p2087_p6 = pnand %p2086_p5, %p2080_p1 }
 0x6a5   : > { %v1372_v33 = vpop.permute.xlu0 %1371 }
 0x6a6   : > { %v2514_v34 = vadd.f32 %v1372_v33, %v1364_v32 }
 0x6a8   : > { %v1375_v35 = vsel %vm592_vm0, %v2514_v34, 0.0 }
 0x6a9   : > { %1376 = vadd.xlane.f32.xlu1 %v1375_v35  ;;  %v1396_v51 = vpop.permute.xlu0 %1395 }
 0x736   : > { %v1377_v36 = vpop.xlane.xlu1 %1376 }
 0x737   : > { %v1378_v37 = vmul.f32 0.03125, %v1377_v36 }
 0x739   : > { %v1379_v38 = vsub.f32 %v2514_v34, %v1378_v37 }
 0x73b   : > { %v1380_v39 = vmul.f32 %v1379_v38, %v1379_v38 }
 0x73d   : > { %v1381_v41 = vsel %vm592_vm0, %v1380_v39, 0.0 }
 0x73e   : > { %1382 = vadd.xlane.f32.xlu1 %v1381_v41 }
 0x7cb   : > { %v1383_v45 = vpop.xlane.xlu1 %1382 }
 0x7cc   : > { %v1384_v44 = vmul.f32 0.03125, %v1383_v45 }
 0x7ce   : > { %v1385_v46 = vadd.f32 1e-06, %v1384_v44 }
 0x7d0   : > { %2073 = vrsqrt.f32 %v1385_v46 }
 0x7da   : > { %v2074_v49 = vpop.eup %2073 }
 0x7db   : > { %v1387_v50 = vmul.f32 %v2074_v49, %v1379_v38 }
 0x7dd   : > { %v1393_v52 = vmul.f32 %v1392_v48, %v1387_v50 }
 0x7df   : > { %v1398_v53 = vadd.f32 %v1396_v51, %v1393_v52 }
 0x7e1   : > { %v1399_v54 = vpack.c.bf16 %v1398_v53, %v1398_v53 }
 0x7e3   : > { %1909 = vmatmul.mubr.msk.bf16.vlgmr.msra.gmra.mrb[4].mxu0 %vm592_vm0, %v1399_v54 }
 0x8b6   : > { %v1460_v0 = vpop.f32.mrb[4].mxu0 }
 0x8b7   : > { %v1461_v1 = vadd.f32 %v1782_v63, %v1460_v0  ;;  %v1910_v2 = vpop.f32.mrb[5].mxu0 }
 0x8b8   : > { %v1463_v3 = vpop.f32.mrb[6].mxu0 }
 0x8b9   : > { %v1466_v4 = vmul.f32 %v1461_v1, %v1461_v1  ;;  %v1911_v5 = vpop.f32.mrb[7].mxu0 }
 0x8bb   : > { %v1467_v6 = vmul.f32 %v1466_v4, %v1461_v1 }
 0x8bd   : > { %v1468_v7 = vmul.f32 0.044715, %v1467_v6 }
 0x8bf   : > { %v1469_v8 = vadd.f32 %v1468_v7, %v1461_v1 }
 0x8c1   : > { %v1470_v9 = vmul.f32 0.7978846, %v1469_v8 }
 0x8c3   : > { %2075 = vtanh.f32 %v1470_v9 }
 0x8cd   : > { %v2076_v10 = vpop.eup %2075 }
 0x8ce   : > { %v1472_v11 = vadd.f32 1.0, %v2076_v10 }
 0x8d0   : > { %v1473_v12 = vmul.f32 0.5, %v1472_v11 }
 0x8d2   : > { %v1474_v13 = vmul.f32 %v1473_v12, %v1461_v1 }
 0x8d4   : > { %v1475_v14 = vpack.c.bf16 %v1474_v13, %v1474_v13 }
 0x8d6   : > { %1929 = vmatmul.mubr.bf16.vlgmr.msra.gmra.mrb[4].mxu1 %v1475_v14 }
 0x9a9   : > { %v1581_v16 = vpop.f32.mrb[4].mxu1 }
 0x9aa   : > { %v1582_v17 = vadd.f32 %v1786_v15, %v1581_v16  ;;  %v1930_v18 = vpop.f32.mrb[5].mxu1 }
 0x9ab   : > { %v1584_v19 = vpop.f32.mrb[6].mxu1 }
 0x9ac   : > { %1592 = vrot.lane.b32.xlu1 %v1582_v17, %s2170_s29  ;;  %v1931_v20 = vpop.f32.mrb[7].mxu1  ;;  %s2668_s29 = smov %s2666_s26 }
 0xa1e   : > { %v1593_v23 = vpop.permute.xlu1 %1592 }
 0xa1f   : > { %v1595_v24 = vmul.f32 %v1593_v23, %v1590_v22 }
 0xa21   : > { %1597 = vrot.lane.b32.xlu0 %v1595_v24, %s2166_s23  ;;  %s2669_s23 = sand.u32 1, %s2143_s22  }
 0xa22   : > { %s1603_s24 = scalar_lea.sflag [#allocation5], %s2669_s23 }
 0xa93   : > { %v1598_v25 = vpop.permute.xlu0 %1597 }
 0xa94   : > { %v1600_v26 = vadd.f32 %v1598_v25, %v2514_v34 }
 0xa96   : > { %1601 = vst.msk [vmem:[%s2668_s29] sm:$0xff] %vm592_vm0, %v1600_v26 }
 0xa97   : > { %2090 = shalt.err (!%p2087_p6)
}
 0xa98   : > { %s2091_s27 = scalar_lea.hbm %s2572_s20, 128  ;;  %s2095_s18 = scalar_lea.hbm %s2667_s17, 256 }
 0xa99   : > { %p2092_p7 = scmp.ne.s32.totalorder %s2572_s20, %s2091_s27  ;;  %p2096_p11 = scmp.lt.u32.totalorder %s2572_s20, %s2667_s17 }
 0xa9a   : > { %p2097_p12 = scmp.lt.u32.totalorder %s2095_s18, %s2091_s27  ;;  %p2099_p0 = scmp.lt.u32.totalorder %s2091_s27, %s2572_s20 }
 0xa9b   : > { %p2093_p9 = pnand %p2092_p7, %p2299_p4 }
 0xa9c   : > { %p2098_p13 = por %p2097_p12, %p2096_p11 }
 0xa9d   : > { %p2094_p10 = pneg %p2093_p9 }
 0xa9e   : > { %p2100_p1 = por %p2099_p0, %p2098_p13 }
 0xaa0   : > { %p2101_p2 = pnand %p2100_p1, %p2094_p10 }
 0xaa2   : > { %2104 = shalt.err (!%p2101_p2)
}
 0xaa3   : > { %1932 = dma.vmem_to_hbm [thread:$0]  (%p2299_p4), %s2574_s30, 128, %s2572_s20, %s1603_s24  }
 0xaa4 PF: > { %s2670_s25 = sld [smem:[#allocation10_spill]]  ;;  %s2671_s0 = sld [smem:[#allocation7_spill]] }
 0xaaa   : > { %p1938_p3 = scmp.ge.s32.totalorder %s2670_s25, 2  ;;  %s1629_s19 = sand.u32 1, %s2671_s0  }
 0xaab   : > { %s1630_s26 = scalar_lea.sflag [#allocation5], %s1629_s19 }
 0xaac   : > { %p1935_p5 = pnand %p1938_p3, %p2306_p8 }
 0xaae   : > { %2134 = dma.done.wait (!%p1935_p5), %s1630_s26, 128  }
 0xaaf   : > { %2136 = vsyncadd (!%p1935_p5), %s1630_s26, 4294967168  ;;  %s29_s26 = sadd.s32 1, %s2670_s25   ;;  %s2673_s27 = sld [smem:[#allocation8_spill]] }
 0xab0   : > { %p26_p6 = scmp.ge.s32.totalorder %s29_s26, 4   ;;  %s2674_s23 = sld [smem:[#allocation14_spill]] }
 0xab1   : > { %s2675_s24 = sld [smem:[#allocation9_spill]]  ;;  %s2676_s25 = sld [smem:[#allocation11_spill]] }
 0xab2   : > { %s2677_s21 = smov %s2143_s22  ;;  %28 = sbr.rel (!%p26_p6) target bundleno = 7 (0x7), region = 149 }
 0xab5   : > { %s2678_s22 = smov %s2673_s27 }
 0xab9   :  { %1635 = vsyncpa [#allocation5], 1 }
 0xaba   :  { %1637 = vsyncpa [#allocation5 + $0x1], 1 }

// kernel: tpu_custom_call.1
= control target key start
LH: loop header
LB: loop body
LE: loop exit
PB: predicated region body
PF: predicated region fallthrough
CT: control target
= control target key end

     0   :  { %s2624_s0 = inlined_call_operand.vmem [shape: f32[2,8,32], index: 0, kind: input, shape index: {}]   ;;  %s2625_s1 = inlined_call_operand.vmem [shape: f32[2,1,32], index: 1, kind: input, shape index: {}]   ;;  %s2626_s2 = inlined_call_operand.vmem [shape: bf16[32,192], index: 2, kind: input, shape index: {}]   ;;  %s2627_s3 = inlined_call_operand.vmem [shape: f32[1,192], index: 3, kind: input, shape index: {}]   ;;  %s2628_s4 = inlined_call_operand.vmem [shape: bf16[32,512], index: 4, kind: input, shape index: {}]   ;;  %s2629_s5 = inlined_call_operand.vmem [shape: bf16[32,512], index: 5, kind: input, shape index: {}]   ;;  %s2630_s6 = inlined_call_operand.vmem [shape: bf16[32,512], index: 6, kind: input, shape index: {}]   ;;  %s2631_s7 = inlined_call_operand.vmem [shape: f32[1,512], index: 7, kind: input, shape index: {}]   ;;  %s2632_s8 = inlined_call_operand.vmem [shape: f32[1,512], index: 8, kind: input, shape index: {}]   ;;  %s2633_s9 = inlined_call_operand.vmem [shape: f32[1,512], index: 9, kind: input, shape index: {}]   ;;  %s2634_s10 = inlined_call_operand.vmem [shape: bf16[512,32], index: 10, kind: input, shape index: {}]   ;;  %s2635_s11 = inlined_call_operand.vmem [shape: f32[1,32], index: 11, kind: input, shape index: {}]   ;;  %s2636_s12 = inlined_call_operand.vmem [shape: bf16[32,128], index: 12, kind: input, shape index: {}]   ;;  %s2637_s13 = inlined_call_operand.vmem [shape: f32[1,128], index: 13, kind: input, shape index: {}]   ;;  %s2638_s14 = inlined_call_operand.vmem [shape: bf16[128,32], index: 14, kind: input, shape index: {}]   ;;  %s2639_s15 = inlined_call_operand.vmem [shape: f32[1,32], index: 15, kind: input, shape index: {}]   ;;  %s2640_s16 = inlined_call_operand.hbm [shape: f32[2,8,32], index: 16, kind: output, shape index: {}]  }
   0x1   :  { %2652 = sst [smem:[#allocation15_spill]] %s2624_s0 }
   0x2   :  { %2653 = sst [smem:[#allocation16_spill]] %s2640_s16 }
   0x3   :  { %21 = vsyncpa [#allocation5], 0 }
   0x4   :  { %23 = vsyncpa [#allocation5 + $0x1], 0  ;;  %s2259_s21 = smov 0   ;;  %s2261_s22 = smov 0  }
   0x5   :  { %s2263_s23 = smov 0   ;;  %s2265_s24 = smov 0  }
   0x6   :  { %s2267_s25 = smov 0   ;;  %s2269_s26 = smov 0  }
   0x7 LB: > { %2654 = sst [smem:[#allocation7_spill]] %s2139_s21  ;;  %s1714_s27 = sadd.s32 4294967295, %s2159_s26   ;;  %s2159_s26 = sphi %s2269_s26, %s29_s26   ;;  %s2155_s25 = sphi %s2267_s25, %s2676_s25   ;;  %s2151_s24 = sphi %s2265_s24, %s2675_s24   ;;  %s2147_s23 = sphi %s2263_s23, %s2674_s23   ;;  %s2143_s22 = sphi %s2261_s22, %s2678_s22   ;;  %s2139_s21 = sphi %s2259_s21, %s2677_s21  }
   0x8   : > { %2655 = sst [smem:[#allocation8_spill]] %s2147_s23  ;;  %s1715_s28 = sadd.s32 4294967294, %s2159_s26  }
   0x9   : > { %2656 = sst [smem:[#allocation9_spill]] %s2155_s25  ;;  %s41_s29 = sadd.s32 1, %s2155_s25 }
   0xa   : > { %2657 = sst [smem:[#allocation10_spill]] %s2159_s26  ;;  %s396_s30 = sadd.s32 1, %s2147_s23 }
   0xb   : > { %p43_p0 = scmp.ge.s32.totalorder %s41_s29, 2  ;;  %p406_p1 = scmp.ne.s32.totalorder %s2147_s23, %s2143_s22 }
   0xc   : > { %p407_p2 = scmp.eq.s32.totalorder %s1714_s27, 1  ;;  %p412_p3 = scmp.ne.s32.totalorder %s2143_s22, %s2139_s21 }
   0xd   : > { %s2680_s29 = smov (%p43_p0, %s41_s29), 0  ;;  %p413_p5 = scmp.eq.s32.totalorder %s1715_s28, 1 }
   0xe   : > { %2658 = sst [smem:[#allocation11_spill]] %s2680_s29  ;;  %p2299_p4 = por %p407_p2, %p406_p1 }
   0xf   : > { %s391_s17 = ssub.s32 %s2155_s25, %s2680_s29  ;;  %p1718_p6 = scmp.ge.s32.totalorder %s2159_s26, 1 }
  0x10   : > { %s2659_s0 = scalar_select %p2299_p4, 1, 0 }
  0x11   : > { %p394_p7 = scmp.eq.s32.totalorder %s391_s17, 0  ;;  %p2306_p8 = por %p413_p5, %p412_p3 }
  0x12   : > { %2660 = sst [smem:[#allocation12_spill]] %s2659_s0  ;;  %p486_p9 = scmp.lt.s32.totalorder %s2159_s26, 3 }
  0x13   : > { %s2661_s18 = scalar_select %p2306_p8, 1, 0 }
  0x14   : > { %s2312_s19 = scalar_select %p394_p7, %s2147_s23, %s396_s30  }
  0x15   : > { %2662 = sst [smem:[#allocation13_spill]] %s2661_s18  ;;  %p487_p10 = pnand %p1718_p6, %p486_p9 }
  0x16   : > { %2663 = sst [smem:[#allocation14_spill]] %s2312_s19  ;;  %p538_p11 = scmp.lt.s32.totalorder (!%p487_p10), %s2151_s24, 1  ;;  %v2003_v0 = vld [vmem:[%s2626_s2 + $0x4] ss:$8 sps:$4 sm:$0xff] (!%p487_p10)   ;;  %v2005_v1 = vld [vmem:[%s2626_s2] ss:$8 sps:$4 sm:$0xff] (!%p487_p10)   ;;  %v582_v19 = vlaneseq (!%p487_p10) }
  0x17   : > { %490 = sbr.rel (%p487_p10) target bundleno = 2724 (0xaa4), region = 84  ;;  %s2646_s20 = sand.u32 (!%p487_p10), 1, %s2143_s22   ;;  %v2006_v2 = vld [vmem:[%s2626_s2 + $0x14] ss:$8 sps:$4 sm:$0xff] (!%p487_p10)   ;;  %596 = vmatprep.subr.bf16.mxu0 (!%p487_p10), %v2003_v0  ;;  %v2165_v3 = vmov (!%p487_p10), 0   ;;  %vm592_vm0 = vcmask (!%p487_p10), 261120  }
  0x18   : > { %s2318_s27 = sshll.u32 (!%p487_p10), %s2646_s20, 3  ;;  %628 = vmatprep.mubr.bf16.mxu0 (!%p487_p10), %v2165_v3  ;;  %597 = vmatpush1.bf16.msra.mxu0 (!%p487_p10), %v2005_v1  ;;  %v2008_v4 = vld [vmem:[%s2626_s2 + $0x10] ss:$8 sps:$4 sm:$0xff] (!%p487_p10)   ;;  %s2664_s16 = sld [smem:[#allocation15_spill]] (!%p487_p10)  ;;  %v583_v20 = vshrl.u32 (!%p487_p10), %v582_v19, 7  ;;  %vm668_vm1 = vcmask (!%p487_p10), 257024  }
  0x19   : > { %598 = vmatprep.subr.bf16.mxu0 (!%p487_p10), %v2006_v2  ;;  %v560_v22 = vld [vmem:[%s2627_s3] sm:$0x3] (!%p487_p10)  ;;  %s2166_s23 = smov (!%p487_p10), 96  }
  0x1a   : > { %v2345_v21 = vsub.s32 (!%p487_p10), 0, %v583_v20  ;;  %v588_v23 = vsub.s32 (!%p487_p10), 1, %v583_v20 }
  0x1c   : > { %599 = vmatpush1.bf16.msra.mxu0 (!%p487_p10), %v2008_v4  ;;  %v585_v24 = vrot.slane (!%p487_p10), %v560_v22, %v2345_v21  ;;  %v589_v25 = vrot.slane (!%p487_p10), %v560_v22, %v588_v23 }
  0x1e   : > { %s539_s30 = scalar_select %p538_p11, %s2151_s24, 1 }
  0x20   : > { %s1720_s18 = sshll.u32 %s539_s30, 3  ;;  %s544_s26 = scalar_lea.vmem %s2625_s1, %s539_s30 }
  0x21   : > { %s2339_s0 = scalar_lea.vmem %s2664_s16, %s1720_s18  ;;  %v547_v5 = vld [vmem:[%s544_s26] sm:$0x1]  ;;  %s2362_s18 = smov 0  }
  0x22   : > { %v1721_v6 = vmul.f32 -1.442695, %v547_v5  ;;  %v637_v7 = vld [vmem:[%s2339_s0] sm:$0xff] }
  0x23   : > { %v638_v8 = vsel %vm592_vm0, %v637_v7, 0.0 }
  0x24   : > { %2009 = vpow2.f32 %v1721_v6  ;;  %639 = vadd.xlane.f32.xlu0 %v638_v8 }
  0x2e   : > { %v2010_v9 = vpop.eup %2009 }
  0x2f   : > { %v551_v10 = vadd.f32 1.0, %v2010_v9 }
  0x31   : > { %2011 = vrcp.f32 %v551_v10 }
  0x3b   : > { %v2012_v11 = vpop.eup %2011 }
  0x3c   : > { %v554_v12 = vmul.f32 %v2012_v11, %v547_v5 }
  0x3e   : > { %v555_v13 = vpack.c.bf16 %v554_v12, %v554_v12 }
  0x40   : > { %1726 = vmatmul.mubr.msk.bf16.vlgmr.msra.gmra.mrb[0].mxu0 %vm592_vm0, %v555_v13 }
  0xb1   : > { %v640_v14 = vpop.xlane.xlu0 %639 }
  0xb2   : > { %v642_v15 = vmul.f32 0.03125, %v640_v14 }
  0xb4   : > { %v643_v16 = vsub.f32 %v637_v7, %v642_v15 }
  0xb6   : > { %v644_v17 = vmul.f32 %v643_v16, %v643_v16 }
  0xb8   : > { %v645_v18 = vsel %vm592_vm0, %v644_v17, 0.0 }
  0xb9   : > { %646 = vadd.xlane.f32.xlu0 %v645_v18 }
 0x113   : > { %v630_v26 = vpop.f32.mrb[0].mxu0 }
 0x114   : > { %v631_v27 = vadd.f32 %v630_v26, %v585_v24  ;;  %v632_v28 = vpop.f32.mrb[1].mxu0 }
 0x115   : > { %v2351_v29 = vadd.f32 %v632_v28, %v589_v25  ;;  %v634_v30 = vpop.f32.mrb[2].mxu0 }
 0x116   : > { %v652_v31 = vadd.f32 1.0, %v631_v27  ;;  %v635_v32 = vpop.f32.mrb[3].mxu0  ;;  %v2356_v40 = vrot.slane %v631_v27, %v2345_v21 }
 0x118   : > { %v656_v33 = vrot.slane %v652_v31, %v2345_v21 }
 0x11a   : > { %658 = vrot.lane.b32.xlu1 %v656_v33, %s2166_s23 }
 0x146   : > { %v647_v34 = vpop.xlane.xlu0 %646 }
 0x147   : > { %v648_v35 = vmul.f32 0.03125, %v647_v34 }
 0x149   : > { %v649_v36 = vadd.f32 1e-06, %v648_v35 }
 0x14b   : > { %2013 = vrsqrt.f32 %v649_v36 }
 0x155   : > { %v2014_v37 = vpop.eup %2013 }
 0x156   : > { %v651_v38 = vmul.f32 %v2014_v37, %v643_v16 }
 0x18c   : > { %v659_v39 = vpop.permute.xlu1 %658 }
 0x18d   : > { %v661_v41 = vmul.f32 %v659_v39, %v651_v38 }
 0x18f   : > { %v666_v42 = vadd.f32 %v2356_v40, %v661_v41 }
 0x191   : > { %v667_v43 = vpack.c.bf16 %v666_v42, %v666_v42 }
 0x193   : > { %669 = vst.msk [vmem:[#allocation2] sm:$0xf] %vm668_vm1, %v667_v43 }
 0x19a   : > { %v2359_v44 = vld [vmem:[#allocation2] sm:$0xf] }
 0x19b LB: >> { %v2167_v45 = vmov 0.0   ;;  %s1727_s19 = sshll.u32 %s2163_s18, 7  ;;  %vm2168_vm2 = vmmov 0   ;;  %v754_v50 = vld [vmem:[#allocation2] sm:$0xf]  ;;  %vm933_vm3 = vcmask 64512   ;;  %s2163_s18 = sphi %s2362_s18, %s680_s18  }
 0x19c   : >> { %1876 = vmatprep.subr.bf16.mxu1 %v2167_v45  ;;  %1868 = vmatprep.subr.bf16.mxu0 %v2167_v45  ;;  %s2370_s20 = sshra.s32 %s1727_s19, 7  ;;  %vm953_vm4 = vcmask 1043456   ;;  %s680_s18 = sadd.s32 1, %s2163_s18  }
 0x19d   : >> { %1880 = vmatprep.mubr.msk.bf16.mxu1 %vm2168_vm2, %v2167_v45  ;;  %1872 = vmatprep.mubr.msk.bf16.mxu0 %vm2168_vm2, %v2167_v45  ;;  %s2373_s30 = sshll.u32 %s2370_s20, 2  ;;  %s761_s16 = scalar_lea.vmem %s2632_s8, %s2370_s20 }
 0x19e   : >> { %s756_s25 = scalar_lea.vmem %s2629_s5, %s2373_s30  ;;  %s685_s21 = scalar_lea.vmem %s2628_s4, %s2373_s30  ;;  %v1734_v53 = vld [vmem:[%s761_s16] ss:$0 sm:$0xff] }
 0x19f   : >> { %v2015_v46 = vld [vmem:[%s756_s25] ss:$16 sps:$4 sm:$0xff]   ;;  %s826_s17 = scalar_lea.vmem %s2630_s6, %s2373_s30  ;;  %s690_s19 = scalar_lea.vmem %s2631_s7, %s2370_s20 }
 0x1a0   : >> { %v2016_v47 = vld [vmem:[%s756_s25 + $0x20] ss:$16 sps:$4 sm:$0xff]   ;;  %1877 = vmatpush3.bf16.msra.mxu1 %v2015_v46  ;;  %p677_p12 = scmp.ge.s32.totalorder %s680_s18, 4  }
 0x1a1   : >> { %v2017_v48 = vld [vmem:[%s685_s21] ss:$16 sps:$4 sm:$0xff]   ;;  %1878 = vmatprep.subr.bf16.mxu1 %v2167_v45  ;;  %v2032_v46 = vld [vmem:[%s2634_s10 + $0xc8] sm:$0xff] (%p677_p12)   ;;  %s2169_s25 = smov (%p677_p12), 64   ;;  %s2170_s29 = smov (%p677_p12), 32   ;;  %vm2172_vm5 = vmmov (%p677_p12), 0  }
 0x1a2   : >> { %1869 = vmatpush3.bf16.msra.mxu0 %v2017_v48  ;;  %v2018_v49 = vld [vmem:[%s685_s21 + $0x20] ss:$16 sps:$4 sm:$0xff]   ;;  %v2034_v48 = vld [vmem:[%s2634_s10 + $0x88] sm:$0xff] (%p677_p12)   ;;  %s2666_s26 = scalar_lea.vmem (%p677_p12), [#allocation4], %s2318_s27 }
 0x1a3   : >> { %1870 = vmatprep.subr.bf16.mxu0 %v2167_v45  ;;  %v2019_v51 = vld [vmem:[%s826_s17] ss:$16 sps:$4 sm:$0xff]  }
 0x1a4   : >> { %1879 = vmatpush3.bf16.msra.mxu1 %v2016_v47  ;;  %v2020_v52 = vld [vmem:[%s826_s17 + $0x20] ss:$16 sps:$4 sm:$0xff]   ;;  %s831_s17 = scalar_lea.vmem %s2633_s9, %s2370_s20  ;;  %s1002_s20 = scalar_lea.vmem [#allocation3], %s2373_s30  ;;  %v2033_v47 = vld [vmem:[%s2634_s10 + $0x8] sm:$0xff] (%p677_p12)  }
 0x1a5   : >> { %1892 = vmatprep.subr.bf16.mxu1 %v2167_v45  ;;  %v1729_v57 = vld [vmem:[%s690_s19] ss:$0 sm:$0xff]  ;;  %s1796_s19 = sshll.u32 (%p677_p12), %s2151_s24, 7  ;;  %s1617_s30 = sshll.u32 (%p677_p12), %s2666_s26, 4  ;;  %s2574_s30 = int_to_ptr.vmem [resolvable:$true] %s1617_s30 }
 0x1a6   : >> { %1871 = vmatpush3.bf16.msra.mxu0 %v2018_v49  ;;  %v1739_v10 = vld [vmem:[%s831_s17] ss:$0 sm:$0xff]  ;;  %v2035_v49 = vld [vmem:[%s2634_s10 + $0x50] sm:$0xff] (%p677_p12)   ;;  %s2667_s17 = sld [smem:[#allocation16_spill]] (%p677_p12) }
 0x1a7   : >> { %1881 = vmatmul.mubr.msk.bf16.vlgmr.msra.gmra.mrb[0].mxu1 %vm592_vm0, %v754_v50  ;;  %1884 = vmatprep.subr.bf16.mxu0 %v2167_v45  ;;  %v2027_v41 = vld [vmem:[%s2634_s10 + $0x40] sm:$0xff] (%p677_p12)  }
 0x1a8   : >> { %1894 = vmatprep.mubr.msk.bf16.mxu1 %vm2168_vm2, %v2167_v45  ;;  %v2028_v42 = vld [vmem:[%s2634_s10 + $0xc0] sm:$0xff] (%p677_p12)  }
 0x1a9   : >> { %1873 = vmatmul.mubr.msk.bf16.vlgmr.msra.gmra.mrb[0].mxu0 %vm592_vm0, %v2359_v44  ;;  %v2029_v43 = vld [vmem:[%s2634_s10] sm:$0xff] (%p677_p12)   ;;  %v2031_v44 = vld [vmem:[%s2634_s10 + $0x48] sm:$0xff] (%p677_p12)  }
 0x1aa   : >> { %1888 = vmatprep.mubr.msk.bf16.mxu0 %vm2168_vm2, %v2167_v45  ;;  %1885 = vmatpush3.bf16.msra.mxu0 %v2019_v51  ;;  %v2037_v51 = vld [vmem:[%s2634_s10 + $0x10] sm:$0xff] (%p677_p12)  }
 0x1ab   : >> { %1886 = vmatprep.subr.bf16.mxu0 %v2167_v45 }
 0x1ae   : >> { %1887 = vmatpush3.bf16.msra.mxu0 %v2020_v52  ;;  %v2038_v52 = vld [vmem:[%s2634_s10 + $0x90] sm:$0xff] (%p677_p12)  }
 0x1af   : >> { %1898 = vmatprep.subr.bf16.mxu0 %v2167_v45 }
 0x1b1   : >> { %1889 = vmatmul.mubr.msk.bf16.vlgmr.msra.gmra.mrb[4].mxu0 %vm592_vm0, %v754_v50  ;;  %v2036_v50 = vld [vmem:[%s2634_s10 + $0xd0] sm:$0xff] (%p677_p12)  }
 0x1b2   : >> { %1900 = vmatprep.mubr.msk.bf16.mxu0 %vm2168_vm2, %v2167_v45  ;;  %v2030_v45 = vld [vmem:[%s2634_s10 + $0x80] sm:$0xff] (%p677_p12)  }
 0x27a   : >> { %v818_v54 = vpop.f32.mrb[0].mxu1 }
 0x27b   : >> { %v819_v55 = vadd.f32 %v1734_v53, %v818_v54  ;;  %v1882_v56 = vpop.f32.mrb[1].mxu1  ;;  %v2039_v53 = vld [vmem:[%s2634_s10 + $0x58] sm:$0xff] (%p677_p12)  }
 0x27c   : >> { %v821_v58 = vpop.f32.mrb[2].mxu1  ;;  %v747_v59 = vpop.f32.mrb[0].mxu0  ;;  %v2040_v54 = vld [vmem:[%s2634_s10 + $0xd8] sm:$0xff] (%p677_p12)  }
 0x27d   : >> { %v824_v60 = vpack.c.bf16 %v819_v55, %v819_v55  ;;  %v1883_v61 = vpop.f32.mrb[3].mxu1  ;;  %v1874_v62 = vpop.f32.mrb[1].mxu0  ;;  %v748_v63 = vadd.f32 %v1729_v57, %v747_v59  ;;  %v2041_v55 = vld [vmem:[%s2634_s10 + $0x18] sm:$0xff] (%p677_p12)   ;;  %v2043_v57 = vld [vmem:[%s2634_s10 + $0x60] sm:$0xff] (%p677_p12)  }
 0x27e   : >> { %v750_v0 = vpop.f32.mrb[2].mxu0  ;;  %v2042_v56 = vld [vmem:[%s2634_s10 + $0x98] sm:$0xff] (%p677_p12)   ;;  %v2044_v58 = vld [vmem:[%s2634_s10 + $0xe0] sm:$0xff] (%p677_p12)   ;;  %v2047_v61 = vld [vmem:[%s2634_s10 + $0x68] sm:$0xff] (%p677_p12)  }
 0x27f   : >> { %1893 = vmatpush3.bf16.xpose.msra.mxu1 %v824_v60  ;;  %v1875_v1 = vpop.f32.mrb[3].mxu0  ;;  %v753_v2 = vpack.c.bf16 %v748_v63, %v748_v63  ;;  %v2045_v59 = vld [vmem:[%s2634_s10 + $0x20] sm:$0xff] (%p677_p12)   ;;  %v2048_v62 = vld [vmem:[%s2634_s10 + $0xe8] sm:$0xff] (%p677_p12)  }
 0x280   : > { %1834 = vmatprep.subr.bf16.mxu1 (%p677_p12), %v2028_v42  ;;  %v2046_v60 = vld [vmem:[%s2634_s10 + $0xa0] sm:$0xff] (%p677_p12)   ;;  %v2049_v63 = vld [vmem:[%s2634_s10 + $0x28] sm:$0xff] (%p677_p12)   ;;  %v2051_v1 = vld [vmem:[%s2634_s10 + $0x70] sm:$0xff] (%p677_p12)  }
 0x281   : > { %v2050_v0 = vld [vmem:[%s2634_s10 + $0xa8] sm:$0xff] (%p677_p12)   ;;  %v2063_v42 = vld [vmem:[%s2636_s12] sm:$0xff] (%p677_p12)  }
 0x284   : >> { %v885_v9 = vpop.f32.mrb[4].mxu0 }
 0x285   : >> { %v1890_v11 = vpop.f32.mrb[5].mxu0  ;;  %v886_v12 = vadd.f32 %v1739_v10, %v885_v9 }
 0x286   : >> { %1895 = vmatmul.mubr.bf16.vlgmr.msra.gmra.mrb[4].mxu1 %v753_v2  ;;  %v888_v13 = vpop.f32.mrb[6].mxu0  ;;  %v2052_v2 = vld [vmem:[%s2634_s10 + $0xf0] sm:$0xff] (%p677_p12)  }
 0x287   : >> { %v1891_v14 = vpop.f32.mrb[7].mxu0  ;;  %v891_v15 = vpack.c.bf16 %v886_v12, %v886_v12  ;;  %1835 = vmatpush3.bf16.msra.mxu1 (%p677_p12), %v2030_v45 }
 0x288   : > { %1836 = vmatprep.subr.bf16.mxu1 (%p677_p12), %v2032_v46 }
 0x289   : >> { %v955_v16 = vsel %vm953_vm4, %v891_v15, 0 }
 0x28a   : >> { %1899 = vmatpush3.bf16.msra.mxu0 %v955_v16 }
 0x28b   : > { %1812 = vmatprep.subr.bf16.mxu0 (%p677_p12), %v2027_v41  ;;  %1837 = vmatpush3.bf16.msra.mxu1 (%p677_p12), %v2034_v48 }
 0x28c   : > { %1838 = vmatprep.subr.bf16.mxu1 (%p677_p12), %v2036_v50 }
 0x28f   : > { %1839 = vmatpush3.bf16.msra.mxu1 (%p677_p12), %v2038_v52 }
 0x290   : > { %1840 = vmatprep.subr.bf16.mxu1 (%p677_p12), %v2040_v54 }
 0x293   : > { %1841 = vmatpush3.bf16.msra.mxu1 (%p677_p12), %v2042_v56  ;;  %v2066_v56 = vld [vmem:[%s2638_s14 + $0x8] sm:$0xff] (%p677_p12)  }
 0x294   : > { %1842 = vmatprep.subr.bf16.mxu1 (%p677_p12), %v2044_v58  ;;  %v2068_v58 = vld [vmem:[%s2638_s14 + $0x18] sm:$0xff] (%p677_p12)  }
 0x297   : > { %1843 = vmatpush3.bf16.msra.mxu1 (%p677_p12), %v2046_v60  ;;  %v2070_v60 = vld [vmem:[%s2638_s14 + $0x28] sm:$0xff] (%p677_p12)  }
 0x298   : > { %1844 = vmatprep.subr.bf16.mxu1 (%p677_p12), %v2048_v62  ;;  %v2072_v62 = vld [vmem:[%s2638_s14 + $0x38] sm:$0xff] (%p677_p12)  }
 0x29b   : > { %1845 = vmatpush3.bf16.msra.mxu1 (%p677_p12), %v2050_v0 }
 0x29c   : > { %1846 = vmatprep.subr.bf16.mxu1 (%p677_p12), %v2052_v2 }
 0x359   : >> { %v926_v3 = vpop.f32.mrb[4].mxu1 }
 0x35a   : >> { %v932_v4 = vmul.f32 0.35355338, %v926_v3  ;;  %v1896_v5 = vpop.f32.mrb[5].mxu1  ;;  %v2053_v3 = vld [vmem:[%s2634_s10 + $0x30] sm:$0xff] (%p677_p12)  }
 0x35b   : >> { %v929_v6 = vpop.f32.mrb[6].mxu1  ;;  %v2055_v5 = vld [vmem:[%s2634_s10 + $0x78] sm:$0xff] (%p677_p12)  }
 0x35c   : >> { %v1897_v7 = vpop.f32.mrb[7].mxu1  ;;  %v934_v8 = vsel %vm933_vm3, %v932_v4, -inf  ;;  %v2056_v6 = vld [vmem:[%s2634_s10 + $0xf8] sm:$0xff] (%p677_p12)  }
 0x35d   : >> { %935 = vmax.xlane.f32.xlu0 %v934_v8  ;;  %v2057_v7 = vld [vmem:[%s2634_s10 + $0x38] sm:$0xff] (%p677_p12)  }
 0x35e   : > { %v2058_v8 = vld [vmem:[%s2634_s10 + $0xb8] sm:$0xff] (%p677_p12)  }
 0x3ea   : >> { %v936_v17 = vpop.xlane.xlu0 %935 }
 0x3eb   : >> { %v937_v18 = vmax.f32 %v936_v17, -1e+30  ;;  %v1745_v17 = vld [vmem:[%s2635_s11] ss:$0 sm:$0xff] (%p677_p12) }
 0x3ed   : >> { %v941_v19 = vsub.f32 %v932_v4, %v937_v18  ;;  %v938_v25 = vsub.f32 -1e+30, %v937_v18  ;;  %v2054_v4 = vld [vmem:[%s2634_s10 + $0xb0] sm:$0xff] (%p677_p12)  }
 0x3ee   : > { %1847 = vmatpush3.bf16.msra.mxu1 (%p677_p12), %v2054_v4 }
 0x3ef   : >> { %v942_v20 = vmul.f32 1.442695, %v941_v19  ;;  %v939_v26 = vmul.f32 1.442695, %v938_v25  ;;  %1848 = vmatprep.subr.bf16.mxu1 (%p677_p12), %v2056_v6 }
 0x3f1   : >> { %2021 = vpow2.f32 %v942_v20 }
 0x3f2   : >> { %2023 = vpow2.f32 %v939_v26  ;;  %1849 = vmatpush3.bf16.msra.mxu1 (%p677_p12), %v2058_v8 }
 0x3fb   : >> { %v2022_v22 = vpop.eup %2021 }
 0x3fc   : >> { %v945_v23 = vsel %vm933_vm3, %v2022_v22, 0.0  ;;  %v949_v24 = vpack.c.bf16 %v2022_v22, %v2022_v22  ;;  %v2024_v27 = vpop.eup %2023 }
 0x3fd   : >> { %946 = vadd.xlane.f32.xlu0 %v945_v23  ;;  %v944_v30 = vmul.f32 0.0, %v2024_v27 }
 0x3fe   : >> { %1901 = vmatmul.mubr.msk.bf16.vlgmr.msra.gmra.mrb[8].mxu0 %vm933_vm3, %v949_v24 }
 0x3ff   : > { %1813 = vmatpush3.bf16.msra.mxu0 (%p677_p12), %v2029_v43  ;;  %v2171_v43 = vmov (%p677_p12), 0.0  }
 0x400   : > { %1814 = vmatprep.subr.bf16.mxu0 (%p677_p12), %v2031_v44  ;;  %1912 = vmatprep.subr.bf16.mxu1 (%p677_p12), %v2171_v43 }
 0x403   : > { %1815 = vmatpush3.bf16.msra.mxu0 (%p677_p12), %v2033_v47  ;;  %v1388_v47 = vadd.f32 (%p677_p12), 1.0, %v2351_v29 }
 0x404   : > { %1816 = vmatprep.subr.bf16.mxu0 (%p677_p12), %v2035_v49 }
 0x405   : > { %v1392_v48 = vrot.slane (%p677_p12), %v1388_v47, %v2345_v21 }
 0x407   : > { %1817 = vmatpush3.bf16.msra.mxu0 (%p677_p12), %v2037_v51 }
 0x408   : > { %1818 = vmatprep.subr.bf16.mxu0 (%p677_p12), %v2039_v53 }
 0x40b   : > { %1819 = vmatpush3.bf16.msra.mxu0 (%p677_p12), %v2041_v55  ;;  %v2065_v55 = vld [vmem:[%s2638_s14] sm:$0xff] (%p677_p12)  }
 0x40c   : > { %1820 = vmatprep.subr.bf16.mxu0 (%p677_p12), %v2043_v57  ;;  %v2067_v57 = vld [vmem:[%s2638_s14 + $0x10] sm:$0xff] (%p677_p12)  }
 0x40f   : > { %1821 = vmatpush3.bf16.msra.mxu0 (%p677_p12), %v2045_v59  ;;  %v2069_v59 = vld [vmem:[%s2638_s14 + $0x20] sm:$0xff] (%p677_p12)  }
 0x410   : > { %1822 = vmatprep.subr.bf16.mxu0 (%p677_p12), %v2047_v61  ;;  %v2071_v61 = vld [vmem:[%s2638_s14 + $0x30] sm:$0xff] (%p677_p12)  }
 0x413   : > { %1823 = vmatpush3.bf16.msra.mxu0 (%p677_p12), %v2049_v63  ;;  %v1782_v63 = vld [vmem:[%s2637_s13] ss:$0 sm:$0xff] (%p677_p12) }
 0x414   : > { %1824 = vmatprep.subr.bf16.mxu0 (%p677_p12), %v2051_v1 }
 0x417   : > { %1825 = vmatpush3.bf16.msra.mxu0 (%p677_p12), %v2053_v3 }
 0x418   : > { %1826 = vmatprep.subr.bf16.mxu0 (%p677_p12), %v2055_v5 }
 0x41b   : > { %1827 = vmatpush3.bf16.msra.mxu0 (%p677_p12), %v2057_v7 }
 0x41c   : > { %1904 = vmatprep.subr.bf16.mxu0 (%p677_p12), %v2171_v43 }
 0x48a   : >> { %v947_v28 = vpop.xlane.xlu0 %946 }
 0x48b   : >> { %v948_v31 = vadd.f32 %v947_v28, %v944_v30 }
 0x48d   : >> { %2025 = vrcp.f32 %v948_v31 }
 0x497   : >> { %v2026_v35 = vpop.eup %2025 }
 0x4d1   : >> { %v991_v32 = vpop.f32.mrb[8].mxu0 }
 0x4d2   : >> { %v997_v33 = vadd.f32 %v991_v32, %v944_v30  ;;  %v1902_v34 = vpop.f32.mrb[9].mxu0  ;;  %679 = sbr.rel (!%p677_p12) target bundleno = 411 (0x19b), region = 138  ;;  %v1364_v32 = vld [vmem:[%s2339_s0] sm:$0xff] (%p677_p12)  ;;  %s2173_s0 = smov (%p677_p12), [#allocation4]  }
 0x4d3   : >> { %v994_v36 = vpop.f32.mrb[10].mxu0  ;;  %s2081_s16 = sshll.u32 (%p677_p12), %s2173_s0, 4  ;;  %s2082_s16 = int_to_ptr.vmem [resolvable:$false] %s2081_s16 }
 0x4d4   : >> { %v999_v37 = vmul.f32 %v2026_v35, %v997_v33  ;;  %v1903_v38 = vpop.f32.mrb[11].mxu0  ;;  %p2084_p2 = scmp.lt.s32.totalorder (%p677_p12), %s2574_s30, %s2082_s16 }
 0x4d6   : >> { %v1000_v39 = vpack.c.bf16 %v999_v37, %v999_v37 }
 0x4d8   : >> { %1003 = vst [vmem:[%s1002_s20] sm:$0xf] %v1000_v39  ;;  %s2572_s20 = scalar_lea.hbm (%p677_p12), %s2667_s17, %s1796_s19  ;;  %s2083_s19 = scalar_lea.vmem (%p677_p12), %s2082_s16, 256 }
 0x4df   : > { %v1004_v9 = vld [vmem:[#allocation3] sm:$0xff]  ;;  %v1005_v10 = vld [vmem:[#allocation3 + $0x8] sm:$0xff] }
 0x4e0   : > { %v1746_v11 = vcombine.low %v1004_v9, %v1004_v9  ;;  %v1747_v12 = vcombine.high %v1004_v9, %v1004_v9  ;;  %v1748_v13 = vcombine.low %v1005_v10, %v1005_v10  ;;  %v1749_v14 = vcombine.high %v1005_v10, %v1005_v10 }
 0x4e2   : > { %1315 = vmatprep.mubr.bf16.mxu0 %v1747_v12  ;;  %1355 = vmatprep.mubr.bf16.mxu1 %v1749_v14 }
 0x4e3   : > { %1316 = vmatmul.mubr.bf16.vlgmr.msra.gmra.mrb[0].mxu0 %v1746_v11  ;;  %1356 = vmatmul.mubr.bf16.vlgmr.msra.gmra.mrb[0].mxu1 %v1748_v13 }
 0x4e4   : > { %1905 = vmatpush3.bf16.msra.mxu0 %v2063_v42  ;;  %1908 = vmatprep.mubr.msk.bf16.mxu0 %vm2172_vm5, %v2171_v43 }
 0x4e5   : > { %1906 = vmatprep.subr.bf16.mxu0 %v2171_v43  ;;  %1928 = vmatprep.mubr.msk.bf16.mxu1 %vm2172_vm5, %v2171_v43 }
 0x4e6   : > { %1913 = vmatpush3.bf16.msra.mxu1 %v2065_v55 }
 0x4e7   : > { %1914 = vmatprep.subr.bf16.mxu1 %v2171_v43 }
 0x4ea   : > { %1915 = vmatpush3.bf16.msra.mxu1 %v2066_v56 }
 0x4eb   : > { %1916 = vmatprep.subr.bf16.mxu1 %v2171_v43 }
 0x4ee   : > { %1917 = vmatpush3.bf16.msra.mxu1 %v2067_v57 }
 0x4ef   : > { %1918 = vmatprep.subr.bf16.mxu1 %v2171_v43 }
 0x4f2   : > { %1919 = vmatpush3.bf16.msra.mxu1 %v2068_v58 }
 0x4f3   : > { %1920 = vmatprep.subr.bf16.mxu1 %v2171_v43 }
 0x4f6   : > { %1921 = vmatpush3.bf16.msra.mxu1 %v2069_v59 }
 0x4f7   : > { %1922 = vmatprep.subr.bf16.mxu1 %v2171_v43 }
 0x4fa   : > { %1923 = vmatpush3.bf16.msra.mxu1 %v2070_v60 }
 0x4fb   : > { %1924 = vmatprep.subr.bf16.mxu1 %v2171_v43 }
 0x4fe   : > { %1925 = vmatpush3.bf16.msra.mxu1 %v2071_v61 }
 0x4ff   : > { %1926 = vmatprep.subr.bf16.mxu1 %v2171_v43 }
 0x502   : > { %1927 = vmatpush3.bf16.msra.mxu1 %v2072_v62 }
 0x5b6   : > { %v1828_v15 = vpop.f32.mrb[0].mxu0  ;;  %v1850_v16 = vpop.f32.mrb[0].mxu1 }
 0x5b7   : > { %v1829_v18 = vpop.f32.mrb[1].mxu0  ;;  %v1851_v19 = vpop.f32.mrb[1].mxu1 }
 0x5b8   : > { %v1830_v20 = vadd.f32 %v1829_v18, %v1828_v15  ;;  %v1852_v22 = vadd.f32 %v1851_v19, %v1850_v16  ;;  %v1831_v23 = vpop.f32.mrb[2].mxu0  ;;  %v1853_v24 = vpop.f32.mrb[2].mxu1  ;;  %v1786_v15 = vld [vmem:[%s2639_s15] ss:$0 sm:$0xff] }
 0x5b9   : > { %v1832_v25 = vpop.f32.mrb[3].mxu0  ;;  %v1854_v26 = vpop.f32.mrb[3].mxu1 }
 0x5ba   : > { %v1318_v27 = vadd.f32 %v1830_v20, %v1745_v17 }
 0x5bc   : > { %v1358_v28 = vadd.f32 %v1852_v22, %v1318_v27  ;;  %v1590_v22 = vrot.slane %v2351_v29, %v2345_v21 }
 0x5be   : > { %1366 = vrot.lane.b32.xlu0 %v1358_v28, %s2169_s25 }
 0x630   : > { %v1367_v30 = vpop.permute.xlu0 %1366 }
 0x631   : > { %v1369_v31 = vmul.f32 %v1367_v30, %v2356_v40 }
 0x633   : > { %1371 = vrot.lane.b32.xlu0 %v1369_v31, %s2169_s25  ;;  %s2077_s25 = scalar_lea.vmem %s2574_s30, 128 }
 0x634   : > { %p2078_p13 = scmp.ne.s32.totalorder %s2574_s30, %s2077_s25  ;;  %p2085_p3 = scmp.lt.s32.totalorder %s2083_s19, %s2077_s25 }
 0x636   : > { %p2079_p0 = pnand %p2078_p13, %p2299_p4  ;;  %p2086_p5 = por %p2085_p3, %p2084_p2 }
 0x637   : > { %1395 = vrot.lane.b32.xlu0 %v2356_v40, %s2170_s29  ;;  %v2064_v40 = vld [vmem:[%s2636_s12 + $0x8] sm:$0xff]  }
 0x638   : > { %1907 = vmatpush3.bf16.msra.mxu0 %v2064_v40  ;;  %p2080_p1 = pneg %p2079_p0 }
 0x63a   : > { %p2087_p6 = pnand %p2086_p5, %p2080_p1 }
 0x6a5   : > { %v1372_v33 = vpop.permute.xlu0 %1371 }
 0x6a6   : > { %v2514_v34 = vadd.f32 %v1372_v33, %v1364_v32 }
 0x6a8   : > { %v1375_v35 = vsel %vm592_vm0, %v2514_v34, 0.0 }
 0x6a9   : > { %1376 = vadd.xlane.f32.xlu1 %v1375_v35  ;;  %v1396_v51 = vpop.permute.xlu0 %1395 }
 0x736   : > { %v1377_v36 = vpop.xlane.xlu1 %1376 }
 0x737   : > { %v1378_v37 = vmul.f32 0.03125, %v1377_v36 }
 0x739   : > { %v1379_v38 = vsub.f32 %v2514_v34, %v1378_v37 }
 0x73b   : > { %v1380_v39 = vmul.f32 %v1379_v38, %v1379_v38 }
 0x73d   : > { %v1381_v41 = vsel %vm592_vm0, %v1380_v39, 0.0 }
 0x73e   : > { %1382 = vadd.xlane.f32.xlu1 %v1381_v41 }
 0x7cb   : > { %v1383_v45 = vpop.xlane.xlu1 %1382 }
 0x7cc   : > { %v1384_v44 = vmul.f32 0.03125, %v1383_v45 }
 0x7ce   : > { %v1385_v46 = vadd.f32 1e-06, %v1384_v44 }
 0x7d0   : > { %2073 = vrsqrt.f32 %v1385_v46 }
 0x7da   : > { %v2074_v49 = vpop.eup %2073 }
 0x7db   : > { %v1387_v50 = vmul.f32 %v2074_v49, %v1379_v38 }
 0x7dd   : > { %v1393_v52 = vmul.f32 %v1392_v48, %v1387_v50 }
 0x7df   : > { %v1398_v53 = vadd.f32 %v1396_v51, %v1393_v52 }
 0x7e1   : > { %v1399_v54 = vpack.c.bf16 %v1398_v53, %v1398_v53 }
 0x7e3   : > { %1909 = vmatmul.mubr.msk.bf16.vlgmr.msra.gmra.mrb[4].mxu0 %vm592_vm0, %v1399_v54 }
 0x8b6   : > { %v1460_v0 = vpop.f32.mrb[4].mxu0 }
 0x8b7   : > { %v1461_v1 = vadd.f32 %v1782_v63, %v1460_v0  ;;  %v1910_v2 = vpop.f32.mrb[5].mxu0 }
 0x8b8   : > { %v1463_v3 = vpop.f32.mrb[6].mxu0 }
 0x8b9   : > { %v1466_v4 = vmul.f32 %v1461_v1, %v1461_v1  ;;  %v1911_v5 = vpop.f32.mrb[7].mxu0 }
 0x8bb   : > { %v1467_v6 = vmul.f32 %v1466_v4, %v1461_v1 }
 0x8bd   : > { %v1468_v7 = vmul.f32 0.044715, %v1467_v6 }
 0x8bf   : > { %v1469_v8 = vadd.f32 %v1468_v7, %v1461_v1 }
 0x8c1   : > { %v1470_v9 = vmul.f32 0.7978846, %v1469_v8 }
 0x8c3   : > { %2075 = vtanh.f32 %v1470_v9 }
 0x8cd   : > { %v2076_v10 = vpop.eup %2075 }
 0x8ce   : > { %v1472_v11 = vadd.f32 1.0, %v2076_v10 }
 0x8d0   : > { %v1473_v12 = vmul.f32 0.5, %v1472_v11 }
 0x8d2   : > { %v1474_v13 = vmul.f32 %v1473_v12, %v1461_v1 }
 0x8d4   : > { %v1475_v14 = vpack.c.bf16 %v1474_v13, %v1474_v13 }
 0x8d6   : > { %1929 = vmatmul.mubr.bf16.vlgmr.msra.gmra.mrb[4].mxu1 %v1475_v14 }
 0x9a9   : > { %v1581_v16 = vpop.f32.mrb[4].mxu1 }
 0x9aa   : > { %v1582_v17 = vadd.f32 %v1786_v15, %v1581_v16  ;;  %v1930_v18 = vpop.f32.mrb[5].mxu1 }
 0x9ab   : > { %v1584_v19 = vpop.f32.mrb[6].mxu1 }
 0x9ac   : > { %1592 = vrot.lane.b32.xlu1 %v1582_v17, %s2170_s29  ;;  %v1931_v20 = vpop.f32.mrb[7].mxu1  ;;  %s2668_s29 = smov %s2666_s26 }
 0xa1e   : > { %v1593_v23 = vpop.permute.xlu1 %1592 }
 0xa1f   : > { %v1595_v24 = vmul.f32 %v1593_v23, %v1590_v22 }
 0xa21   : > { %1597 = vrot.lane.b32.xlu0 %v1595_v24, %s2166_s23  ;;  %s2669_s23 = sand.u32 1, %s2143_s22  }
 0xa22   : > { %s1603_s24 = scalar_lea.sflag [#allocation5], %s2669_s23 }
 0xa93   : > { %v1598_v25 = vpop.permute.xlu0 %1597 }
 0xa94   : > { %v1600_v26 = vadd.f32 %v1598_v25, %v2514_v34 }
 0xa96   : > { %1601 = vst.msk [vmem:[%s2668_s29] sm:$0xff] %vm592_vm0, %v1600_v26 }
 0xa97   : > { %2090 = shalt.err (!%p2087_p6)
}
 0xa98   : > { %s2091_s27 = scalar_lea.hbm %s2572_s20, 128  ;;  %s2095_s18 = scalar_lea.hbm %s2667_s17, 256 }
 0xa99   : > { %p2092_p7 = scmp.ne.s32.totalorder %s2572_s20, %s2091_s27  ;;  %p2096_p11 = scmp.lt.u32.totalorder %s2572_s20, %s2667_s17 }
 0xa9a   : > { %p2097_p12 = scmp.lt.u32.totalorder %s2095_s18, %s2091_s27  ;;  %p2099_p0 = scmp.lt.u32.totalorder %s2091_s27, %s2572_s20 }
 0xa9b   : > { %p2093_p9 = pnand %p2092_p7, %p2299_p4 }
 0xa9c   : > { %p2098_p13 = por %p2097_p12, %p2096_p11 }
 0xa9d   : > { %p2094_p10 = pneg %p2093_p9 }
 0xa9e   : > { %p2100_p1 = por %p2099_p0, %p2098_p13 }
 0xaa0   : > { %p2101_p2 = pnand %p2100_p1, %p2094_p10 }
 0xaa2   : > { %2104 = shalt.err (!%p2101_p2)
}
 0xaa3   : > { %1932 = dma.vmem_to_hbm [thread:$0]  (%p2299_p4), %s2574_s30, 128, %s2572_s20, %s1603_s24  }
 0xaa4 PF: > { %s2670_s25 = sld [smem:[#allocation10_spill]]  ;;  %s2671_s0 = sld [smem:[#allocation7_spill]] }
 0xaaa   : > { %p1938_p3 = scmp.ge.s32.totalorder %s2670_s25, 2  ;;  %s1629_s19 = sand.u32 1, %s2671_s0  }
 0xaab   : > { %s1630_s26 = scalar_lea.sflag [#allocation5], %s1629_s19 }
 0xaac   : > { %p1935_p5 = pnand %p1938_p3, %p2306_p8 }
 0xaae   : > { %2134 = dma.done.wait (!%p1935_p5), %s1630_s26, 128  }
 0xaaf   : > { %2136 = vsyncadd (!%p1935_p5), %s1630_s26, 4294967168  ;;  %s29_s26 = sadd.s32 1, %s2670_s25   ;;  %s2673_s27 = sld [smem:[#allocation8_spill]] }
 0xab0   : > { %p26_p6 = scmp.ge.s32.totalorder %s29_s26, 4   ;;  %s2674_s23 = sld [smem:[#allocation14_spill]] }
 0xab1   : > { %s2675_s24 = sld [smem:[#allocation9_spill]]  ;;  %s2676_s25 = sld [smem:[#allocation11_spill]] }
 0xab2   : > { %s2677_s21 = smov %s2143_s22  ;;  %28 = sbr.rel (!%p26_p6) target bundleno = 7 (0x7), region = 149 }
 0xab5   : > { %s2678_s22 = smov %s2673_s27 }
 0xab9   :  { %1635 = vsyncpa [#allocation5], 1 }
 0xaba   :  { %1637 = vsyncpa [#allocation5 + $0x1], 1 }

</bundles_post_ra>
